<compile_context>
chip_gen: v5e
topology: v5e:2x2
jax: 0.10.0
libtpu: 0.0.40
codegen_flags: <defaults>
</compile_context>

<pallas_src>
import functools

import jax
import jax.numpy as jnp
from jax.experimental import pallas as pl
from jax.experimental.pallas import tpu as pltpu

F = 4          # numeric features used by the fused program
C = 8          # categories of the categorical variable
H = 32         # hidden width of the learned shape-function MLP
MAX_TR = 2048  # max (rows-of-128) per grid step -> 2048*128 = 256K samples/step
MIN_STEPS = 4  # aim for >= MIN_STEPS grid steps (v7x megacore sharding)


# ----------------------------- kernel ---------------------------------------

def _mlp_f32(x0, w1_ref, b1_ref, w2_ref):
    # c = sum_j w2[j] * tanh(w1[j] * x0 + b1[j]); all-f32 path (v5e).
    acc = jnp.zeros(x0.shape, dtype=jnp.float32)
    for j in range(H):  # unrolled; lane-dense VPU/EUP work
        acc = acc + w2_ref[j] * jnp.tanh(x0 * w1_ref[j] + b1_ref[j])
    return acc


def _mlp_bf16(x0, w1_ref, b1_ref, w2_ref):
    # bf16 pre-activation + tanh (packed vregs, bf16 VPU/EUP on v6e/v7x),
    # accumulation stays in f32 for numerical safety.
    x0b = x0.astype(jnp.bfloat16)
    acc = jnp.zeros(x0.shape, dtype=jnp.float32)
    for j in range(H):
        pre = x0b * w1_ref[j].astype(jnp.bfloat16) + b1_ref[j].astype(jnp.bfloat16)
        t = jnp.tanh(pre)
        acc = acc + w2_ref[j] * t.astype(jnp.float32)
    return acc


def gp_program_kernel(x_ref, ids_ref, w1_ref, b1_ref, w2_ref, b2_ref,
                      theta_ref, o_ref, *, use_bf16_mlp):
    # x_ref: (F, TR, 128) VMEM  -- each feature is a lane-dense slab
    # ids_ref: (TR, 128) int32; params in SMEM; output (TR, 128) f32.

    # --- learned shape function first: minimal live set (x0 + acc) ----------
    x0 = x_ref[0]
    if use_bf16_mlp:
        acc = _mlp_bf16(x0, w1_ref, b1_ref, w2_ref)
    else:
        acc = _mlp_f32(x0, w1_ref, b1_ref, w2_ref)
    c = acc + b2_ref[0]

    # --- categorical shape function: (ohe @ theta) == theta[cat_id] ----------
    ids = ids_ref[...]                       # (TR, 128) int32
    d = jnp.zeros(ids.shape, dtype=jnp.float32)
    for k in range(C):
        d = jnp.where(ids == k, theta_ref[k], d)
    cd = c - d

    # --- torch_safe_division(x0, x1): 0 where |x1| <= 1e-3 -------------------
    x1 = x_ref[1]
    mask = jnp.abs(x1) > 1e-3
    denom = jnp.where(mask, x1, 1.0)
    a = jnp.where(mask, x0 * pl.reciprocal(denom, approx=False), 0.0)

    # --- sin / cos / mul / add ------------------------------------------------
    left = a + jnp.sin(x_ref[2]) * jnp.cos(x_ref[3])

    # --- final mul, lane-dense unmasked store --------------------------------
    o_ref[...] = (left * cd).astype(o_ref.dtype)


# ----------------------------- wrapper ---------------------------------------

def _pick_tile_rows(nr):
    """Rows-of-128 per grid step: large (amortize ~0.35us/step) but keep
    >= MIN_STEPS steps when possible; multiple of 8 for the (8,128) rule."""
    tr = min(MAX_TR, pl.cdiv(nr, MIN_STEPS))
    tr = max(8, -(-tr // 8) * 8)
    return tr


def stage_inputs(X, cat_ids):
    """One-time layout staging: feature-major lane-dense slabs, zero-padded to
    a whole number of (TR, 128) tiles.  gplearn evaluates many programs on the
    same X, so this is computed once and reused across all program kernels."""
    N, f_in = X.shape
    assert f_in == F
    nr = pl.cdiv(N, 128)
    tr = _pick_tile_rows(nr)
    nr_pad = pl.cdiv(nr, tr) * tr
    n_pad = nr_pad * 128

    Xt = jnp.transpose(X)                                   # (F, N)
    Xt = jnp.pad(Xt, ((0, 0), (0, n_pad - N))).reshape(F, nr_pad, 128)
    ids2 = jnp.pad(cat_ids.astype(jnp.int32), (0, n_pad - N)).reshape(nr_pad, 128)
    meta = {"n": N, "nr_pad": nr_pad, "tr": tr}
    return Xt, ids2, meta


def gp_model_forward(staged, w1, b1, w2, b2, theta, *, precision="auto"):
    """staged = stage_inputs(X, cat_ids); params: w1/b1/w2 (H,), b2 (1,),
    theta (C,).  Returns (N,) f32."""
    Xt, ids2, meta = staged
    N, nr_pad, tr = meta["n"], meta["nr_pad"], meta["tr"]
    grid = (nr_pad // tr,)

    if precision == "auto":
        kind = jax.devices()[0].device_kind.lower()
        use_bf16 = ("v6" in kind) or ("v7" in kind)   # no bf16 VPU/EUP on v5e
    else:
        use_bf16 = (precision == "bf16")

    smem_spec = pl.BlockSpec(memory_space=pltpu.MemorySpace.SMEM)

    n_pad_elems = nr_pad * 128
    cost = pl.CostEstimate(
        flops=int((4 * H + 28) * n_pad_elems),          # MLP + selects + left
        transcendentals=int((H + 3) * n_pad_elems),     # H tanh + sin + cos + recip
        bytes_accessed=int((F * 4 + 4 + 4) * n_pad_elems),
    )

    kern = functools.partial(gp_program_kernel, use_bf16_mlp=use_bf16)

    out2 = pl.pallas_call(
        kern,
        out_shape=jax.ShapeDtypeStruct((nr_pad, 128), jnp.float32),
        grid_spec=pltpu.PrefetchScalarGridSpec(
            num_scalar_prefetch=0,
            grid=grid,
            in_specs=[
                pl.BlockSpec((F, tr, 128), lambda i: (0, i, 0)),  # X features
                pl.BlockSpec((tr, 128), lambda i: (i, 0)),        # cat ids
                smem_spec,  # w1 (H,)
                smem_spec,  # b1 (H,)
                smem_spec,  # w2 (H,)
                smem_spec,  # b2 (1,)
                smem_spec,  # theta (C,)
            ],
            out_specs=pl.BlockSpec((tr, 128), lambda i: (i, 0)),
        ),
        compiler_params=pltpu.CompilerParams(
            dimension_semantics=("parallel",),
            vmem_limit_bytes=32 * 1024 * 1024,   # v5e default is only 16 MiB
        ),
        cost_estimate=cost,
    )(Xt, ids2, w1, b1, w2, b2, theta)

    return out2.reshape(nr_pad * 128)[:N]


# ----------------------------- reference --------------------------------------

def reference_forward(X, cat_ids, w1, b1, w2, b2, theta):
    mask = jnp.abs(X[:, 1]) > 1e-3
    a = jnp.where(mask, X[:, 0] / jnp.where(mask, X[:, 1], 1.0), 0.0)
    b = jnp.sin(X[:, 2]) * jnp.cos(X[:, 3])
    h = jnp.tanh(X[:, 0][:, None] * w1[None, :] + b1[None, :])
    c = h @ w2 + b2[0]
    d = theta[cat_ids]
    return (a + b) * (c - d)


if __name__ == "__main__":
    key = jax.random.PRNGKey(0)
    kx, kc, k1, k2, k3, k4, k5 = jax.random.split(key, 7)

    # N deliberately NOT a multiple of 128*TR: exercises the padding path.
    N = 2000
    X = jax.random.normal(kx, (N, F), dtype=jnp.float32)
    cat_ids = jax.random.randint(kc, (N,), 0, C, dtype=jnp.int32)

    # deterministic parameter init (stand-ins for shape_class / ParameterDict)
    w1 = 0.5 * jax.random.normal(k1, (H,), dtype=jnp.float32)
    b1 = 0.1 * jax.random.normal(k2, (H,), dtype=jnp.float32)
    w2 = 0.5 * jax.random.normal(k3, (H,), dtype=jnp.float32)
    b2 = 0.1 * jax.random.normal(k4, (1,), dtype=jnp.float32)
    theta = jax.random.normal(k5, (C,), dtype=jnp.float32)

    ref = reference_forward(X, cat_ids, w1, b1, w2, b2, theta)

    # Stage X once; reused across all fused program kernels evaluated on it.
    staged = stage_inputs(X, cat_ids)

    # Strict correctness: full-f32 kernel path vs f32 reference.
    out_f32 = gp_model_forward(staged, w1, b1, w2, b2, theta, precision="f32")
    out_f32 = jax.block_until_ready(out_f32)
    assert out_f32.shape == (N,) and out_f32.dtype == jnp.float32
    assert jnp.allclose(out_f32, ref, atol=1e-3, rtol=1e-4), "f32 mismatch vs reference"

    # Hardware-default path (bf16 MLP on v6e/v7x, f32 elsewhere): norm-based check
    # since the bf16 tanh path is an explicit accuracy/throughput trade.
    out = gp_model_forward(staged, w1, b1, w2, b2, theta, precision="auto")
    out = jax.block_until_ready(out)
    rel_l2 = jnp.linalg.norm(out - ref) / (jnp.linalg.norm(ref) + 1e-12)
    assert out.shape == (N,) and float(rel_l2) < 5e-2, "auto-precision path diverged"

    print("KERNEL_OK")
</pallas_src>

<mosaic_0001>
module attributes {stable_mosaic.version = 11 : i64} {
  func.func @gp_program_kernel(%arg0: i32, %arg1: memref<4x8x128xf32, #tpu.memory_space<vmem>>, %arg2: memref<8x128xi32, #tpu.memory_space<vmem>>, %arg3: memref<32xf32, #tpu.memory_space<smem>>, %arg4: memref<32xf32, #tpu.memory_space<smem>>, %arg5: memref<32xf32, #tpu.memory_space<smem>>, %arg6: memref<1xf32, #tpu.memory_space<smem>>, %arg7: memref<8xf32, #tpu.memory_space<smem>>, %arg8: memref<8x128xf32, #tpu.memory_space<vmem>>) attributes {dimension_semantics = [#tpu.dimension_semantics<parallel>], iteration_bounds = array<i64: 2>, scalar_prefetch = 0 : i64, scratch_operands = 0 : i64, tpu.core_type = #tpu.core_type<tc>, window_params = [{transform_indices = @transform_0, window_bounds = array<i64: 4, 8, 128>}, {transform_indices = @transform_1, window_bounds = array<i64: 8, 128>}, {transform_indices = @transform_2, window_bounds = array<i64: 32>}, {transform_indices = @transform_3, window_bounds = array<i64: 32>}, {transform_indices = @transform_4, window_bounds = array<i64: 32>}, {transform_indices = @transform_5, window_bounds = array<i64: 1>}, {transform_indices = @transform_6, window_bounds = array<i64: 8>}, {transform_indices = @transform_7, window_bounds = array<i64: 8, 128>}]} {
    %c0 = arith.constant 0 : index
    %c0_0 = arith.constant 0 : index
    %c0_1 = arith.constant 0 : index
    %0 = vector.load %arg1[%c0, %c0_0, %c0_1] : memref<4x8x128xf32, #tpu.memory_space<vmem>>, vector<1x8x128xf32>
    %1 = vector.shape_cast %0 : vector<1x8x128xf32> to vector<8x128xf32>
    %cst = arith.constant 0.000000e+00 : f32
    %2 = vector.broadcast %cst : f32 to vector<8x128xf32>
    %c0_2 = arith.constant 0 : index
    %3 = memref.load %arg5[%c0_2] : memref<32xf32, #tpu.memory_space<smem>>
    %c0_3 = arith.constant 0 : index
    %4 = memref.load %arg3[%c0_3] : memref<32xf32, #tpu.memory_space<smem>>
    %5 = vector.broadcast %4 : f32 to vector<8x128xf32>
    %6 = arith.mulf %1, %5 : vector<8x128xf32>
    %c0_4 = arith.constant 0 : index
    %7 = memref.load %arg4[%c0_4] : memref<32xf32, #tpu.memory_space<smem>>
    %8 = vector.broadcast %7 : f32 to vector<8x128xf32>
    %9 = arith.addf %6, %8 : vector<8x128xf32>
    %10 = math.tanh %9 : vector<8x128xf32>
    %11 = vector.broadcast %3 : f32 to vector<8x128xf32>
    %12 = arith.mulf %11, %10 : vector<8x128xf32>
    %13 = arith.addf %2, %12 : vector<8x128xf32>
    %c1 = arith.constant 1 : index
    %14 = memref.load %arg5[%c1] : memref<32xf32, #tpu.memory_space<smem>>
    %c1_5 = arith.constant 1 : index
    %15 = memref.load %arg3[%c1_5] : memref<32xf32, #tpu.memory_space<smem>>
    %16 = vector.broadcast %15 : f32 to vector<8x128xf32>
    %17 = arith.mulf %1, %16 : vector<8x128xf32>
    %c1_6 = arith.constant 1 : index
    %18 = memref.load %arg4[%c1_6] : memref<32xf32, #tpu.memory_space<smem>>
    %19 = vector.broadcast %18 : f32 to vector<8x128xf32>
    %20 = arith.addf %17, %19 : vector<8x128xf32>
    %21 = math.tanh %20 : vector<8x128xf32>
    %22 = vector.broadcast %14 : f32 to vector<8x128xf32>
    %23 = arith.mulf %22, %21 : vector<8x128xf32>
    %24 = arith.addf %13, %23 : vector<8x128xf32>
    %c2 = arith.constant 2 : index
    %25 = memref.load %arg5[%c2] : memref<32xf32, #tpu.memory_space<smem>>
    %c2_7 = arith.constant 2 : index
    %26 = memref.load %arg3[%c2_7] : memref<32xf32, #tpu.memory_space<smem>>
    %27 = vector.broadcast %26 : f32 to vector<8x128xf32>
    %28 = arith.mulf %1, %27 : vector<8x128xf32>
    %c2_8 = arith.constant 2 : index
    %29 = memref.load %arg4[%c2_8] : memref<32xf32, #tpu.memory_space<smem>>
    %30 = vector.broadcast %29 : f32 to vector<8x128xf32>
    %31 = arith.addf %28, %30 : vector<8x128xf32>
    %32 = math.tanh %31 : vector<8x128xf32>
    %33 = vector.broadcast %25 : f32 to vector<8x128xf32>
    %34 = arith.mulf %33, %32 : vector<8x128xf32>
    %35 = arith.addf %24, %34 : vector<8x128xf32>
    %c3 = arith.constant 3 : index
    %36 = memref.load %arg5[%c3] : memref<32xf32, #tpu.memory_space<smem>>
    %c3_9 = arith.constant 3 : index
    %37 = memref.load %arg3[%c3_9] : memref<32xf32, #tpu.memory_space<smem>>
    %38 = vector.broadcast %37 : f32 to vector<8x128xf32>
    %39 = arith.mulf %1, %38 : vector<8x128xf32>
    %c3_10 = arith.constant 3 : index
    %40 = memref.load %arg4[%c3_10] : memref<32xf32, #tpu.memory_space<smem>>
    %41 = vector.broadcast %40 : f32 to vector<8x128xf32>
    %42 = arith.addf %39, %41 : vector<8x128xf32>
    %43 = math.tanh %42 : vector<8x128xf32>
    %44 = vector.broadcast %36 : f32 to vector<8x128xf32>
    %45 = arith.mulf %44, %43 : vector<8x128xf32>
    %46 = arith.addf %35, %45 : vector<8x128xf32>
    %c4 = arith.constant 4 : index
    %47 = memref.load %arg5[%c4] : memref<32xf32, #tpu.memory_space<smem>>
    %c4_11 = arith.constant 4 : index
    %48 = memref.load %arg3[%c4_11] : memref<32xf32, #tpu.memory_space<smem>>
    %49 = vector.broadcast %48 : f32 to vector<8x128xf32>
    %50 = arith.mulf %1, %49 : vector<8x128xf32>
    %c4_12 = arith.constant 4 : index
    %51 = memref.load %arg4[%c4_12] : memref<32xf32, #tpu.memory_space<smem>>
    %52 = vector.broadcast %51 : f32 to vector<8x128xf32>
    %53 = arith.addf %50, %52 : vector<8x128xf32>
    %54 = math.tanh %53 : vector<8x128xf32>
    %55 = vector.broadcast %47 : f32 to vector<8x128xf32>
    %56 = arith.mulf %55, %54 : vector<8x128xf32>
    %57 = arith.addf %46, %56 : vector<8x128xf32>
    %c5 = arith.constant 5 : index
    %58 = memref.load %arg5[%c5] : memref<32xf32, #tpu.memory_space<smem>>
    %c5_13 = arith.constant 5 : index
    %59 = memref.load %arg3[%c5_13] : memref<32xf32, #tpu.memory_space<smem>>
    %60 = vector.broadcast %59 : f32 to vector<8x128xf32>
    %61 = arith.mulf %1, %60 : vector<8x128xf32>
    %c5_14 = arith.constant 5 : index
    %62 = memref.load %arg4[%c5_14] : memref<32xf32, #tpu.memory_space<smem>>
    %63 = vector.broadcast %62 : f32 to vector<8x128xf32>
    %64 = arith.addf %61, %63 : vector<8x128xf32>
    %65 = math.tanh %64 : vector<8x128xf32>
    %66 = vector.broadcast %58 : f32 to vector<8x128xf32>
    %67 = arith.mulf %66, %65 : vector<8x128xf32>
    %68 = arith.addf %57, %67 : vector<8x128xf32>
    %c6 = arith.constant 6 : index
    %69 = memref.load %arg5[%c6] : memref<32xf32, #tpu.memory_space<smem>>
    %c6_15 = arith.constant 6 : index
    %70 = memref.load %arg3[%c6_15] : memref<32xf32, #tpu.memory_space<smem>>
    %71 = vector.broadcast %70 : f32 to vector<8x128xf32>
    %72 = arith.mulf %1, %71 : vector<8x128xf32>
    %c6_16 = arith.constant 6 : index
    %73 = memref.load %arg4[%c6_16] : memref<32xf32, #tpu.memory_space<smem>>
    %74 = vector.broadcast %73 : f32 to vector<8x128xf32>
    %75 = arith.addf %72, %74 : vector<8x128xf32>
    %76 = math.tanh %75 : vector<8x128xf32>
    %77 = vector.broadcast %69 : f32 to vector<8x128xf32>
    %78 = arith.mulf %77, %76 : vector<8x128xf32>
    %79 = arith.addf %68, %78 : vector<8x128xf32>
    %c7 = arith.constant 7 : index
    %80 = memref.load %arg5[%c7] : memref<32xf32, #tpu.memory_space<smem>>
    %c7_17 = arith.constant 7 : index
    %81 = memref.load %arg3[%c7_17] : memref<32xf32, #tpu.memory_space<smem>>
    %82 = vector.broadcast %81 : f32 to vector<8x128xf32>
    %83 = arith.mulf %1, %82 : vector<8x128xf32>
    %c7_18 = arith.constant 7 : index
    %84 = memref.load %arg4[%c7_18] : memref<32xf32, #tpu.memory_space<smem>>
    %85 = vector.broadcast %84 : f32 to vector<8x128xf32>
    %86 = arith.addf %83, %85 : vector<8x128xf32>
    %87 = math.tanh %86 : vector<8x128xf32>
    %88 = vector.broadcast %80 : f32 to vector<8x128xf32>
    %89 = arith.mulf %88, %87 : vector<8x128xf32>
    %90 = arith.addf %79, %89 : vector<8x128xf32>
    %c8 = arith.constant 8 : index
    %91 = memref.load %arg5[%c8] : memref<32xf32, #tpu.memory_space<smem>>
    %c8_19 = arith.constant 8 : index
    %92 = memref.load %arg3[%c8_19] : memref<32xf32, #tpu.memory_space<smem>>
    %93 = vector.broadcast %92 : f32 to vector<8x128xf32>
    %94 = arith.mulf %1, %93 : vector<8x128xf32>
    %c8_20 = arith.constant 8 : index
    %95 = memref.load %arg4[%c8_20] : memref<32xf32, #tpu.memory_space<smem>>
    %96 = vector.broadcast %95 : f32 to vector<8x128xf32>
    %97 = arith.addf %94, %96 : vector<8x128xf32>
    %98 = math.tanh %97 : vector<8x128xf32>
    %99 = vector.broadcast %91 : f32 to vector<8x128xf32>
    %100 = arith.mulf %99, %98 : vector<8x128xf32>
    %101 = arith.addf %90, %100 : vector<8x128xf32>
    %c9 = arith.constant 9 : index
    %102 = memref.load %arg5[%c9] : memref<32xf32, #tpu.memory_space<smem>>
    %c9_21 = arith.constant 9 : index
    %103 = memref.load %arg3[%c9_21] : memref<32xf32, #tpu.memory_space<smem>>
    %104 = vector.broadcast %103 : f32 to vector<8x128xf32>
    %105 = arith.mulf %1, %104 : vector<8x128xf32>
    %c9_22 = arith.constant 9 : index
    %106 = memref.load %arg4[%c9_22] : memref<32xf32, #tpu.memory_space<smem>>
    %107 = vector.broadcast %106 : f32 to vector<8x128xf32>
    %108 = arith.addf %105, %107 : vector<8x128xf32>
    %109 = math.tanh %108 : vector<8x128xf32>
    %110 = vector.broadcast %102 : f32 to vector<8x128xf32>
    %111 = arith.mulf %110, %109 : vector<8x128xf32>
    %112 = arith.addf %101, %111 : vector<8x128xf32>
    %c10 = arith.constant 10 : index
    %113 = memref.load %arg5[%c10] : memref<32xf32, #tpu.memory_space<smem>>
    %c10_23 = arith.constant 10 : index
    %114 = memref.load %arg3[%c10_23] : memref<32xf32, #tpu.memory_space<smem>>
    %115 = vector.broadcast %114 : f32 to vector<8x128xf32>
    %116 = arith.mulf %1, %115 : vector<8x128xf32>
    %c10_24 = arith.constant 10 : index
    %117 = memref.load %arg4[%c10_24] : memref<32xf32, #tpu.memory_space<smem>>
    %118 = vector.broadcast %117 : f32 to vector<8x128xf32>
    %119 = arith.addf %116, %118 : vector<8x128xf32>
    %120 = math.tanh %119 : vector<8x128xf32>
    %121 = vector.broadcast %113 : f32 to vector<8x128xf32>
    %122 = arith.mulf %121, %120 : vector<8x128xf32>
    %123 = arith.addf %112, %122 : vector<8x128xf32>
    %c11 = arith.constant 11 : index
    %124 = memref.load %arg5[%c11] : memref<32xf32, #tpu.memory_space<smem>>
    %c11_25 = arith.constant 11 : index
    %125 = memref.load %arg3[%c11_25] : memref<32xf32, #tpu.memory_space<smem>>
    %126 = vector.broadcast %125 : f32 to vector<8x128xf32>
    %127 = arith.mulf %1, %126 : vector<8x128xf32>
    %c11_26 = arith.constant 11 : index
    %128 = memref.load %arg4[%c11_26] : memref<32xf32, #tpu.memory_space<smem>>
    %129 = vector.broadcast %128 : f32 to vector<8x128xf32>
    %130 = arith.addf %127, %129 : vector<8x128xf32>
    %131 = math.tanh %130 : vector<8x128xf32>
    %132 = vector.broadcast %124 : f32 to vector<8x128xf32>
    %133 = arith.mulf %132, %131 : vector<8x128xf32>
    %134 = arith.addf %123, %133 : vector<8x128xf32>
    %c12 = arith.constant 12 : index
    %135 = memref.load %arg5[%c12] : memref<32xf32, #tpu.memory_space<smem>>
    %c12_27 = arith.constant 12 : index
    %136 = memref.load %arg3[%c12_27] : memref<32xf32, #tpu.memory_space<smem>>
    %137 = vector.broadcast %136 : f32 to vector<8x128xf32>
    %138 = arith.mulf %1, %137 : vector<8x128xf32>
    %c12_28 = arith.constant 12 : index
    %139 = memref.load %arg4[%c12_28] : memref<32xf32, #tpu.memory_space<smem>>
    %140 = vector.broadcast %139 : f32 to vector<8x128xf32>
    %141 = arith.addf %138, %140 : vector<8x128xf32>
    %142 = math.tanh %141 : vector<8x128xf32>
    %143 = vector.broadcast %135 : f32 to vector<8x128xf32>
    %144 = arith.mulf %143, %142 : vector<8x128xf32>
    %145 = arith.addf %134, %144 : vector<8x128xf32>
    %c13 = arith.constant 13 : index
    %146 = memref.load %arg5[%c13] : memref<32xf32, #tpu.memory_space<smem>>
    %c13_29 = arith.constant 13 : index
    %147 = memref.load %arg3[%c13_29] : memref<32xf32, #tpu.memory_space<smem>>
    %148 = vector.broadcast %147 : f32 to vector<8x128xf32>
    %149 = arith.mulf %1, %148 : vector<8x128xf32>
    %c13_30 = arith.constant 13 : index
    %150 = memref.load %arg4[%c13_30] : memref<32xf32, #tpu.memory_space<smem>>
    %151 = vector.broadcast %150 : f32 to vector<8x128xf32>
    %152 = arith.addf %149, %151 : vector<8x128xf32>
    %153 = math.tanh %152 : vector<8x128xf32>
    %154 = vector.broadcast %146 : f32 to vector<8x128xf32>
    %155 = arith.mulf %154, %153 : vector<8x128xf32>
    %156 = arith.addf %145, %155 : vector<8x128xf32>
    %c14 = arith.constant 14 : index
    %157 = memref.load %arg5[%c14] : memref<32xf32, #tpu.memory_space<smem>>
    %c14_31 = arith.constant 14 : index
    %158 = memref.load %arg3[%c14_31] : memref<32xf32, #tpu.memory_space<smem>>
    %159 = vector.broadcast %158 : f32 to vector<8x128xf32>
    %160 = arith.mulf %1, %159 : vector<8x128xf32>
    %c14_32 = arith.constant 14 : index
    %161 = memref.load %arg4[%c14_32] : memref<32xf32, #tpu.memory_space<smem>>
    %162 = vector.broadcast %161 : f32 to vector<8x128xf32>
    %163 = arith.addf %160, %162 : vector<8x128xf32>
    %164 = math.tanh %163 : vector<8x128xf32>
    %165 = vector.broadcast %157 : f32 to vector<8x128xf32>
    %166 = arith.mulf %165, %164 : vector<8x128xf32>
    %167 = arith.addf %156, %166 : vector<8x128xf32>
    %c15 = arith.constant 15 : index
    %168 = memref.load %arg5[%c15] : memref<32xf32, #tpu.memory_space<smem>>
    %c15_33 = arith.constant 15 : index
    %169 = memref.load %arg3[%c15_33] : memref<32xf32, #tpu.memory_space<smem>>
    %170 = vector.broadcast %169 : f32 to vector<8x128xf32>
    %171 = arith.mulf %1, %170 : vector<8x128xf32>
    %c15_34 = arith.constant 15 : index
    %172 = memref.load %arg4[%c15_34] : memref<32xf32, #tpu.memory_space<smem>>
    %173 = vector.broadcast %172 : f32 to vector<8x128xf32>
    %174 = arith.addf %171, %173 : vector<8x128xf32>
    %175 = math.tanh %174 : vector<8x128xf32>
    %176 = vector.broadcast %168 : f32 to vector<8x128xf32>
    %177 = arith.mulf %176, %175 : vector<8x128xf32>
    %178 = arith.addf %167, %177 : vector<8x128xf32>
    %c16 = arith.constant 16 : index
    %179 = memref.load %arg5[%c16] : memref<32xf32, #tpu.memory_space<smem>>
    %c16_35 = arith.constant 16 : index
    %180 = memref.load %arg3[%c16_35] : memref<32xf32, #tpu.memory_space<smem>>
    %181 = vector.broadcast %180 : f32 to vector<8x128xf32>
    %182 = arith.mulf %1, %181 : vector<8x128xf32>
    %c16_36 = arith.constant 16 : index
    %183 = memref.load %arg4[%c16_36] : memref<32xf32, #tpu.memory_space<smem>>
    %184 = vector.broadcast %183 : f32 to vector<8x128xf32>
    %185 = arith.addf %182, %184 : vector<8x128xf32>
    %186 = math.tanh %185 : vector<8x128xf32>
    %187 = vector.broadcast %179 : f32 to vector<8x128xf32>
    %188 = arith.mulf %187, %186 : vector<8x128xf32>
    %189 = arith.addf %178, %188 : vector<8x128xf32>
    %c17 = arith.constant 17 : index
    %190 = memref.load %arg5[%c17] : memref<32xf32, #tpu.memory_space<smem>>
    %c17_37 = arith.constant 17 : index
    %191 = memref.load %arg3[%c17_37] : memref<32xf32, #tpu.memory_space<smem>>
    %192 = vector.broadcast %191 : f32 to vector<8x128xf32>
    %193 = arith.mulf %1, %192 : vector<8x128xf32>
    %c17_38 = arith.constant 17 : index
    %194 = memref.load %arg4[%c17_38] : memref<32xf32, #tpu.memory_space<smem>>
    %195 = vector.broadcast %194 : f32 to vector<8x128xf32>
    %196 = arith.addf %193, %195 : vector<8x128xf32>
    %197 = math.tanh %196 : vector<8x128xf32>
    %198 = vector.broadcast %190 : f32 to vector<8x128xf32>
    %199 = arith.mulf %198, %197 : vector<8x128xf32>
    %200 = arith.addf %189, %199 : vector<8x128xf32>
    %c18 = arith.constant 18 : index
    %201 = memref.load %arg5[%c18] : memref<32xf32, #tpu.memory_space<smem>>
    %c18_39 = arith.constant 18 : index
    %202 = memref.load %arg3[%c18_39] : memref<32xf32, #tpu.memory_space<smem>>
    %203 = vector.broadcast %202 : f32 to vector<8x128xf32>
    %204 = arith.mulf %1, %203 : vector<8x128xf32>
    %c18_40 = arith.constant 18 : index
    %205 = memref.load %arg4[%c18_40] : memref<32xf32, #tpu.memory_space<smem>>
    %206 = vector.broadcast %205 : f32 to vector<8x128xf32>
    %207 = arith.addf %204, %206 : vector<8x128xf32>
    %208 = math.tanh %207 : vector<8x128xf32>
    %209 = vector.broadcast %201 : f32 to vector<8x128xf32>
    %210 = arith.mulf %209, %208 : vector<8x128xf32>
    %211 = arith.addf %200, %210 : vector<8x128xf32>
    %c19 = arith.constant 19 : index
    %212 = memref.load %arg5[%c19] : memref<32xf32, #tpu.memory_space<smem>>
    %c19_41 = arith.constant 19 : index
    %213 = memref.load %arg3[%c19_41] : memref<32xf32, #tpu.memory_space<smem>>
    %214 = vector.broadcast %213 : f32 to vector<8x128xf32>
    %215 = arith.mulf %1, %214 : vector<8x128xf32>
    %c19_42 = arith.constant 19 : index
    %216 = memref.load %arg4[%c19_42] : memref<32xf32, #tpu.memory_space<smem>>
    %217 = vector.broadcast %216 : f32 to vector<8x128xf32>
    %218 = arith.addf %215, %217 : vector<8x128xf32>
    %219 = math.tanh %218 : vector<8x128xf32>
    %220 = vector.broadcast %212 : f32 to vector<8x128xf32>
    %221 = arith.mulf %220, %219 : vector<8x128xf32>
    %222 = arith.addf %211, %221 : vector<8x128xf32>
    %c20 = arith.constant 20 : index
    %223 = memref.load %arg5[%c20] : memref<32xf32, #tpu.memory_space<smem>>
    %c20_43 = arith.constant 20 : index
    %224 = memref.load %arg3[%c20_43] : memref<32xf32, #tpu.memory_space<smem>>
    %225 = vector.broadcast %224 : f32 to vector<8x128xf32>
    %226 = arith.mulf %1, %225 : vector<8x128xf32>
    %c20_44 = arith.constant 20 : index
    %227 = memref.load %arg4[%c20_44] : memref<32xf32, #tpu.memory_space<smem>>
    %228 = vector.broadcast %227 : f32 to vector<8x128xf32>
    %229 = arith.addf %226, %228 : vector<8x128xf32>
    %230 = math.tanh %229 : vector<8x128xf32>
    %231 = vector.broadcast %223 : f32 to vector<8x128xf32>
    %232 = arith.mulf %231, %230 : vector<8x128xf32>
    %233 = arith.addf %222, %232 : vector<8x128xf32>
    %c21 = arith.constant 21 : index
    %234 = memref.load %arg5[%c21] : memref<32xf32, #tpu.memory_space<smem>>
    %c21_45 = arith.constant 21 : index
    %235 = memref.load %arg3[%c21_45] : memref<32xf32, #tpu.memory_space<smem>>
    %236 = vector.broadcast %235 : f32 to vector<8x128xf32>
    %237 = arith.mulf %1, %236 : vector<8x128xf32>
    %c21_46 = arith.constant 21 : index
    %238 = memref.load %arg4[%c21_46] : memref<32xf32, #tpu.memory_space<smem>>
    %239 = vector.broadcast %238 : f32 to vector<8x128xf32>
    %240 = arith.addf %237, %239 : vector<8x128xf32>
    %241 = math.tanh %240 : vector<8x128xf32>
    %242 = vector.broadcast %234 : f32 to vector<8x128xf32>
    %243 = arith.mulf %242, %241 : vector<8x128xf32>
    %244 = arith.addf %233, %243 : vector<8x128xf32>
    %c22 = arith.constant 22 : index
    %245 = memref.load %arg5[%c22] : memref<32xf32, #tpu.memory_space<smem>>
    %c22_47 = arith.constant 22 : index
    %246 = memref.load %arg3[%c22_47] : memref<32xf32, #tpu.memory_space<smem>>
    %247 = vector.broadcast %246 : f32 to vector<8x128xf32>
    %248 = arith.mulf %1, %247 : vector<8x128xf32>
    %c22_48 = arith.constant 22 : index
    %249 = memref.load %arg4[%c22_48] : memref<32xf32, #tpu.memory_space<smem>>
    %250 = vector.broadcast %249 : f32 to vector<8x128xf32>
    %251 = arith.addf %248, %250 : vector<8x128xf32>
    %252 = math.tanh %251 : vector<8x128xf32>
    %253 = vector.broadcast %245 : f32 to vector<8x128xf32>
    %254 = arith.mulf %253, %252 : vector<8x128xf32>
    %255 = arith.addf %244, %254 : vector<8x128xf32>
    %c23 = arith.constant 23 : index
    %256 = memref.load %arg5[%c23] : memref<32xf32, #tpu.memory_space<smem>>
    %c23_49 = arith.constant 23 : index
    %257 = memref.load %arg3[%c23_49] : memref<32xf32, #tpu.memory_space<smem>>
    %258 = vector.broadcast %257 : f32 to vector<8x128xf32>
    %259 = arith.mulf %1, %258 : vector<8x128xf32>
    %c23_50 = arith.constant 23 : index
    %260 = memref.load %arg4[%c23_50] : memref<32xf32, #tpu.memory_space<smem>>
    %261 = vector.broadcast %260 : f32 to vector<8x128xf32>
    %262 = arith.addf %259, %261 : vector<8x128xf32>
    %263 = math.tanh %262 : vector<8x128xf32>
    %264 = vector.broadcast %256 : f32 to vector<8x128xf32>
    %265 = arith.mulf %264, %263 : vector<8x128xf32>
    %266 = arith.addf %255, %265 : vector<8x128xf32>
    %c24 = arith.constant 24 : index
    %267 = memref.load %arg5[%c24] : memref<32xf32, #tpu.memory_space<smem>>
    %c24_51 = arith.constant 24 : index
    %268 = memref.load %arg3[%c24_51] : memref<32xf32, #tpu.memory_space<smem>>
    %269 = vector.broadcast %268 : f32 to vector<8x128xf32>
    %270 = arith.mulf %1, %269 : vector<8x128xf32>
    %c24_52 = arith.constant 24 : index
    %271 = memref.load %arg4[%c24_52] : memref<32xf32, #tpu.memory_space<smem>>
    %272 = vector.broadcast %271 : f32 to vector<8x128xf32>
    %273 = arith.addf %270, %272 : vector<8x128xf32>
    %274 = math.tanh %273 : vector<8x128xf32>
    %275 = vector.broadcast %267 : f32 to vector<8x128xf32>
    %276 = arith.mulf %275, %274 : vector<8x128xf32>
    %277 = arith.addf %266, %276 : vector<8x128xf32>
    %c25 = arith.constant 25 : index
    %278 = memref.load %arg5[%c25] : memref<32xf32, #tpu.memory_space<smem>>
    %c25_53 = arith.constant 25 : index
    %279 = memref.load %arg3[%c25_53] : memref<32xf32, #tpu.memory_space<smem>>
    %280 = vector.broadcast %279 : f32 to vector<8x128xf32>
    %281 = arith.mulf %1, %280 : vector<8x128xf32>
    %c25_54 = arith.constant 25 : index
    %282 = memref.load %arg4[%c25_54] : memref<32xf32, #tpu.memory_space<smem>>
    %283 = vector.broadcast %282 : f32 to vector<8x128xf32>
    %284 = arith.addf %281, %283 : vector<8x128xf32>
    %285 = math.tanh %284 : vector<8x128xf32>
    %286 = vector.broadcast %278 : f32 to vector<8x128xf32>
    %287 = arith.mulf %286, %285 : vector<8x128xf32>
    %288 = arith.addf %277, %287 : vector<8x128xf32>
    %c26 = arith.constant 26 : index
    %289 = memref.load %arg5[%c26] : memref<32xf32, #tpu.memory_space<smem>>
    %c26_55 = arith.constant 26 : index
    %290 = memref.load %arg3[%c26_55] : memref<32xf32, #tpu.memory_space<smem>>
    %291 = vector.broadcast %290 : f32 to vector<8x128xf32>
    %292 = arith.mulf %1, %291 : vector<8x128xf32>
    %c26_56 = arith.constant 26 : index
    %293 = memref.load %arg4[%c26_56] : memref<32xf32, #tpu.memory_space<smem>>
    %294 = vector.broadcast %293 : f32 to vector<8x128xf32>
    %295 = arith.addf %292, %294 : vector<8x128xf32>
    %296 = math.tanh %295 : vector<8x128xf32>
    %297 = vector.broadcast %289 : f32 to vector<8x128xf32>
    %298 = arith.mulf %297, %296 : vector<8x128xf32>
    %299 = arith.addf %288, %298 : vector<8x128xf32>
    %c27 = arith.constant 27 : index
    %300 = memref.load %arg5[%c27] : memref<32xf32, #tpu.memory_space<smem>>
    %c27_57 = arith.constant 27 : index
    %301 = memref.load %arg3[%c27_57] : memref<32xf32, #tpu.memory_space<smem>>
    %302 = vector.broadcast %301 : f32 to vector<8x128xf32>
    %303 = arith.mulf %1, %302 : vector<8x128xf32>
    %c27_58 = arith.constant 27 : index
    %304 = memref.load %arg4[%c27_58] : memref<32xf32, #tpu.memory_space<smem>>
    %305 = vector.broadcast %304 : f32 to vector<8x128xf32>
    %306 = arith.addf %303, %305 : vector<8x128xf32>
    %307 = math.tanh %306 : vector<8x128xf32>
    %308 = vector.broadcast %300 : f32 to vector<8x128xf32>
    %309 = arith.mulf %308, %307 : vector<8x128xf32>
    %310 = arith.addf %299, %309 : vector<8x128xf32>
    %c28 = arith.constant 28 : index
    %311 = memref.load %arg5[%c28] : memref<32xf32, #tpu.memory_space<smem>>
    %c28_59 = arith.constant 28 : index
    %312 = memref.load %arg3[%c28_59] : memref<32xf32, #tpu.memory_space<smem>>
    %313 = vector.broadcast %312 : f32 to vector<8x128xf32>
    %314 = arith.mulf %1, %313 : vector<8x128xf32>
    %c28_60 = arith.constant 28 : index
    %315 = memref.load %arg4[%c28_60] : memref<32xf32, #tpu.memory_space<smem>>
    %316 = vector.broadcast %315 : f32 to vector<8x128xf32>
    %317 = arith.addf %314, %316 : vector<8x128xf32>
    %318 = math.tanh %317 : vector<8x128xf32>
    %319 = vector.broadcast %311 : f32 to vector<8x128xf32>
    %320 = arith.mulf %319, %318 : vector<8x128xf32>
    %321 = arith.addf %310, %320 : vector<8x128xf32>
    %c29 = arith.constant 29 : index
    %322 = memref.load %arg5[%c29] : memref<32xf32, #tpu.memory_space<smem>>
    %c29_61 = arith.constant 29 : index
    %323 = memref.load %arg3[%c29_61] : memref<32xf32, #tpu.memory_space<smem>>
    %324 = vector.broadcast %323 : f32 to vector<8x128xf32>
    %325 = arith.mulf %1, %324 : vector<8x128xf32>
    %c29_62 = arith.constant 29 : index
    %326 = memref.load %arg4[%c29_62] : memref<32xf32, #tpu.memory_space<smem>>
    %327 = vector.broadcast %326 : f32 to vector<8x128xf32>
    %328 = arith.addf %325, %327 : vector<8x128xf32>
    %329 = math.tanh %328 : vector<8x128xf32>
    %330 = vector.broadcast %322 : f32 to vector<8x128xf32>
    %331 = arith.mulf %330, %329 : vector<8x128xf32>
    %332 = arith.addf %321, %331 : vector<8x128xf32>
    %c30 = arith.constant 30 : index
    %333 = memref.load %arg5[%c30] : memref<32xf32, #tpu.memory_space<smem>>
    %c30_63 = arith.constant 30 : index
    %334 = memref.load %arg3[%c30_63] : memref<32xf32, #tpu.memory_space<smem>>
    %335 = vector.broadcast %334 : f32 to vector<8x128xf32>
    %336 = arith.mulf %1, %335 : vector<8x128xf32>
    %c30_64 = arith.constant 30 : index
    %337 = memref.load %arg4[%c30_64] : memref<32xf32, #tpu.memory_space<smem>>
    %338 = vector.broadcast %337 : f32 to vector<8x128xf32>
    %339 = arith.addf %336, %338 : vector<8x128xf32>
    %340 = math.tanh %339 : vector<8x128xf32>
    %341 = vector.broadcast %333 : f32 to vector<8x128xf32>
    %342 = arith.mulf %341, %340 : vector<8x128xf32>
    %343 = arith.addf %332, %342 : vector<8x128xf32>
    %c31 = arith.constant 31 : index
    %344 = memref.load %arg5[%c31] : memref<32xf32, #tpu.memory_space<smem>>
    %c31_65 = arith.constant 31 : index
    %345 = memref.load %arg3[%c31_65] : memref<32xf32, #tpu.memory_space<smem>>
    %346 = vector.broadcast %345 : f32 to vector<8x128xf32>
    %347 = arith.mulf %1, %346 : vector<8x128xf32>
    %c31_66 = arith.constant 31 : index
    %348 = memref.load %arg4[%c31_66] : memref<32xf32, #tpu.memory_space<smem>>
    %349 = vector.broadcast %348 : f32 to vector<8x128xf32>
    %350 = arith.addf %347, %349 : vector<8x128xf32>
    %351 = math.tanh %350 : vector<8x128xf32>
    %352 = vector.broadcast %344 : f32 to vector<8x128xf32>
    %353 = arith.mulf %352, %351 : vector<8x128xf32>
    %354 = arith.addf %343, %353 : vector<8x128xf32>
    %c0_67 = arith.constant 0 : index
    %355 = memref.load %arg6[%c0_67] : memref<1xf32, #tpu.memory_space<smem>>
    %356 = vector.broadcast %355 : f32 to vector<8x128xf32>
    %357 = arith.addf %354, %356 : vector<8x128xf32>
    %c0_68 = arith.constant 0 : index
    %c0_69 = arith.constant 0 : index
    %358 = vector.load %arg2[%c0_68, %c0_69] : memref<8x128xi32, #tpu.memory_space<vmem>>, vector<8x128xi32>
    %cst_70 = arith.constant 0.000000e+00 : f32
    %359 = vector.broadcast %cst_70 : f32 to vector<8x128xf32>
    %c0_i32 = arith.constant 0 : i32
    %360 = vector.broadcast %c0_i32 : i32 to vector<8x128xi32>
    %361 = arith.cmpi eq, %358, %360 : vector<8x128xi32>
    %c0_71 = arith.constant 0 : index
    %362 = memref.load %arg7[%c0_71] : memref<8xf32, #tpu.memory_space<smem>>
    %363 = vector.broadcast %362 : f32 to vector<8x128xf32>
    %364 = arith.select %361, %363, %359 : vector<8x128xi1>, vector<8x128xf32>
    %c1_i32 = arith.constant 1 : i32
    %365 = vector.broadcast %c1_i32 : i32 to vector<8x128xi32>
    %366 = arith.cmpi eq, %358, %365 : vector<8x128xi32>
    %c1_72 = arith.constant 1 : index
    %367 = memref.load %arg7[%c1_72] : memref<8xf32, #tpu.memory_space<smem>>
    %368 = vector.broadcast %367 : f32 to vector<8x128xf32>
    %369 = arith.select %366, %368, %364 : vector<8x128xi1>, vector<8x128xf32>
    %c2_i32 = arith.constant 2 : i32
    %370 = vector.broadcast %c2_i32 : i32 to vector<8x128xi32>
    %371 = arith.cmpi eq, %358, %370 : vector<8x128xi32>
    %c2_73 = arith.constant 2 : index
    %372 = memref.load %arg7[%c2_73] : memref<8xf32, #tpu.memory_space<smem>>
    %373 = vector.broadcast %372 : f32 to vector<8x128xf32>
    %374 = arith.select %371, %373, %369 : vector<8x128xi1>, vector<8x128xf32>
    %c3_i32 = arith.constant 3 : i32
    %375 = vector.broadcast %c3_i32 : i32 to vector<8x128xi32>
    %376 = arith.cmpi eq, %358, %375 : vector<8x128xi32>
    %c3_74 = arith.constant 3 : index
    %377 = memref.load %arg7[%c3_74] : memref<8xf32, #tpu.memory_space<smem>>
    %378 = vector.broadcast %377 : f32 to vector<8x128xf32>
    %379 = arith.select %376, %378, %374 : vector<8x128xi1>, vector<8x128xf32>
    %c4_i32 = arith.constant 4 : i32
    %380 = vector.broadcast %c4_i32 : i32 to vector<8x128xi32>
    %381 = arith.cmpi eq, %358, %380 : vector<8x128xi32>
    %c4_75 = arith.constant 4 : index
    %382 = memref.load %arg7[%c4_75] : memref<8xf32, #tpu.memory_space<smem>>
    %383 = vector.broadcast %382 : f32 to vector<8x128xf32>
    %384 = arith.select %381, %383, %379 : vector<8x128xi1>, vector<8x128xf32>
    %c5_i32 = arith.constant 5 : i32
    %385 = vector.broadcast %c5_i32 : i32 to vector<8x128xi32>
    %386 = arith.cmpi eq, %358, %385 : vector<8x128xi32>
    %c5_76 = arith.constant 5 : index
    %387 = memref.load %arg7[%c5_76] : memref<8xf32, #tpu.memory_space<smem>>
    %388 = vector.broadcast %387 : f32 to vector<8x128xf32>
    %389 = arith.select %386, %388, %384 : vector<8x128xi1>, vector<8x128xf32>
    %c6_i32 = arith.constant 6 : i32
    %390 = vector.broadcast %c6_i32 : i32 to vector<8x128xi32>
    %391 = arith.cmpi eq, %358, %390 : vector<8x128xi32>
    %c6_77 = arith.constant 6 : index
    %392 = memref.load %arg7[%c6_77] : memref<8xf32, #tpu.memory_space<smem>>
    %393 = vector.broadcast %392 : f32 to vector<8x128xf32>
    %394 = arith.select %391, %393, %389 : vector<8x128xi1>, vector<8x128xf32>
    %c7_i32 = arith.constant 7 : i32
    %395 = vector.broadcast %c7_i32 : i32 to vector<8x128xi32>
    %396 = arith.cmpi eq, %358, %395 : vector<8x128xi32>
    %c7_78 = arith.constant 7 : index
    %397 = memref.load %arg7[%c7_78] : memref<8xf32, #tpu.memory_space<smem>>
    %398 = vector.broadcast %397 : f32 to vector<8x128xf32>
    %399 = arith.select %396, %398, %394 : vector<8x128xi1>, vector<8x128xf32>
    %400 = arith.subf %357, %399 : vector<8x128xf32>
    %c1_79 = arith.constant 1 : index
    %c0_80 = arith.constant 0 : index
    %c0_81 = arith.constant 0 : index
    %401 = vector.load %arg1[%c1_79, %c0_80, %c0_81] : memref<4x8x128xf32, #tpu.memory_space<vmem>>, vector<1x8x128xf32>
    %402 = vector.shape_cast %401 : vector<1x8x128xf32> to vector<8x128xf32>
    %403 = math.absf %402 : vector<8x128xf32>
    %cst_82 = arith.constant 1.000000e-03 : f32
    %404 = vector.broadcast %cst_82 : f32 to vector<8x128xf32>
    %405 = arith.cmpf ogt, %403, %404 : vector<8x128xf32>
    %cst_83 = arith.constant 1.000000e+00 : f32
    %406 = vector.broadcast %cst_83 : f32 to vector<8x128xf32>
    %407 = arith.select %405, %402, %406 : vector<8x128xi1>, vector<8x128xf32>
    %408 = tpu.reciprocal %407 : vector<8x128xf32> -> vector<8x128xf32>
    %409 = arith.mulf %1, %408 : vector<8x128xf32>
    %cst_84 = arith.constant 0.000000e+00 : f32
    %410 = vector.broadcast %cst_84 : f32 to vector<8x128xf32>
    %411 = arith.select %405, %409, %410 : vector<8x128xi1>, vector<8x128xf32>
    %c2_85 = arith.constant 2 : index
    %c0_86 = arith.constant 0 : index
    %c0_87 = arith.constant 0 : index
    %412 = vector.load %arg1[%c2_85, %c0_86, %c0_87] : memref<4x8x128xf32, #tpu.memory_space<vmem>>, vector<1x8x128xf32>
    %413 = vector.shape_cast %412 : vector<1x8x128xf32> to vector<8x128xf32>
    %414 = math.sin %413 : vector<8x128xf32>
    %c3_88 = arith.constant 3 : index
    %c0_89 = arith.constant 0 : index
    %c0_90 = arith.constant 0 : index
    %415 = vector.load %arg1[%c3_88, %c0_89, %c0_90] : memref<4x8x128xf32, #tpu.memory_space<vmem>>, vector<1x8x128xf32>
    %416 = vector.shape_cast %415 : vector<1x8x128xf32> to vector<8x128xf32>
    %417 = math.cos %416 : vector<8x128xf32>
    %418 = arith.mulf %414, %417 : vector<8x128xf32>
    %419 = arith.addf %411, %418 : vector<8x128xf32>
    %420 = arith.mulf %419, %400 : vector<8x128xf32>
    %c0_91 = arith.constant 0 : index
    %c0_92 = arith.constant 0 : index
    %421 = vector.load %arg8[%c0_91, %c0_92] : memref<8x128xf32, #tpu.memory_space<vmem>>, vector<8x128xf32>
    tpu.vector_store %arg8[%c0_91, %c0_92], %420 {strides = array<i32>} : memref<8x128xf32, #tpu.memory_space<vmem>>, vector<8x128xf32>,
    return
  }
  func.func @transform_0(%arg0: i32) -> (i32, i32, i32) {
    %c0_i32 = arith.constant 0 : i32
    %c0_i32_0 = arith.constant 0 : i32
    %c0_i32_1 = arith.constant 0 : i32
    return %c0_i32, %arg0, %c0_i32_0 : i32, i32, i32
  }
  func.func @transform_1(%arg0: i32) -> (i32, i32) {
    %c0_i32 = arith.constant 0 : i32
    %c0_i32_0 = arith.constant 0 : i32
    return %arg0, %c0_i32 : i32, i32
  }
  func.func @transform_2(%arg0: i32) -> i32 {
    %c0_i32 = arith.constant 0 : i32
    %c0_i32_0 = arith.constant 0 : i32
    return %c0_i32 : i32
  }
  func.func @transform_3(%arg0: i32) -> i32 {
    %c0_i32 = arith.constant 0 : i32
    %c0_i32_0 = arith.constant 0 : i32
    return %c0_i32 : i32
  }
  func.func @transform_4(%arg0: i32) -> i32 {
    %c0_i32 = arith.constant 0 : i32
    %c0_i32_0 = arith.constant 0 : i32
    return %c0_i32 : i32
  }
  func.func @transform_5(%arg0: i32) -> i32 {
    %c0_i32 = arith.constant 0 : i32
    %c0_i32_0 = arith.constant 0 : i32
    return %c0_i32 : i32
  }
  func.func @transform_6(%arg0: i32) -> i32 {
    %c0_i32 = arith.constant 0 : i32
    %c0_i32_0 = arith.constant 0 : i32
    return %c0_i32 : i32
  }
  func.func @transform_7(%arg0: i32) -> (i32, i32) {
    %c0_i32 = arith.constant 0 : i32
    %c0_i32_0 = arith.constant 0 : i32
    return %arg0, %c0_i32 : i32, i32
  }
}

</mosaic_0001>

<bundles_post_ra>
// kernel: tpu_custom_call.1
= control target key start
LH: loop header
LB: loop body
LE: loop exit
PB: predicated region body
PF: predicated region fallthrough
CT: control target
= control target key end

     0   :  { %s2743_s0 = inlined_call_operand.hbm [shape: f32[4,16,128], index: 0, kind: input, shape index: {}]   ;;  %s2744_s1 = inlined_call_operand.hbm [shape: s32[16,128], index: 1, kind: input, shape index: {}]   ;;  %s2745_s2 = inlined_call_operand.vmem [shape: f32[32], index: 2, kind: input, shape index: {}]   ;;  %s2746_s3 = inlined_call_operand.vmem [shape: f32[32], index: 3, kind: input, shape index: {}]   ;;  %s2747_s4 = inlined_call_operand.vmem [shape: f32[32], index: 4, kind: input, shape index: {}]   ;;  %s2748_s5 = inlined_call_operand.<no memory space> [shape: f32[1], index: 5, kind: input, shape index: {}]   ;;  %s2749_s6 = inlined_call_operand.vmem [shape: f32[8], index: 6, kind: input, shape index: {}]   ;;  %s2750_s7 = inlined_call_operand.hbm [shape: f32[16,128], index: 7, kind: output, shape index: {}]  }
   0x1   :  { %2752 = sst [smem:[#allocation23_spill]] %s2743_s0 }
   0x2   :  { %2753 = sst [smem:[#allocation24_spill]] %s2745_s2 }
   0x3   :  { %2754 = sst [smem:[#allocation25_spill]] %s2746_s3 }
   0x4   :  { %2755 = sst [smem:[#allocation26_spill]] %s2747_s4 }
   0x5   :  { %2756 = sst [smem:[#allocation27_spill]] %s2749_s6 }
   0x6   :  { %12 = sst [smem:[#allocation2]] %s2748_s5 }
   0x7   :  { %13 = vsyncpa [#allocation4], 0 }
   0x8   :  { %15 = vsyncpa [#allocation4 + $0x1], 0 }
   0x9   :  { %16 = vsyncpa [#allocation8], 0 }
   0xa   :  { %18 = vsyncpa [#allocation8 + $0x1], 0 }
   0xb   :  { %19 = vsyncpa [#allocation6], 0 }
   0xc   :  { %20 = vsyncpa [#allocation11], 0 }
   0xd   :  { %21 = vsyncpa [#allocation14], 0 }
   0xe   :  { %22 = vsyncpa [#allocation5], 0 }
   0xf   :  { %24 = vsyncpa [#allocation5 + $0x1], 0  ;;  %s1831_s26 = smov 0   ;;  %s1833_s27 = smov 0  }
  0x10   :  { %s1835_s28 = smov 0   ;;  %s1837_s29 = smov 0  }
  0x11 LB: > { %s1852_s5 = sadd.s32 4294967295, %s1772_s29   ;;  %s1268_s30 = sadd.s32 4294967294, %s1772_s29   ;;  %s1772_s29 = sphi %s1837_s29, %s2784_s29   ;;  %s1768_s28 = sphi %s1835_s28, %s2783_s28   ;;  %s1764_s27 = sphi %s1833_s27, %s2782_s27   ;;  %s1760_s26 = sphi %s1831_s26, %s2781_s26  }
  0x12   : > { %p50_p0 = scmp.ne.s32.totalorder %s1764_s27, %s1760_s26  ;;  %p51_p1 = scmp.eq.s32.totalorder %s1852_s5, 0 }
  0x13   : > { %p205_p2 = scmp.eq.s32.totalorder %s1852_s5, 1  ;;  %p211_p3 = scmp.eq.s32.totalorder %s1268_s30, 1 }
  0x14   : > { %p1861_p4 = por %p51_p1, %p50_p0  ;;  %p1269_p5 = scmp.ge.s32.totalorder %s1772_s29, 1 }
  0x15   : > { %p1866_p6 = por %p211_p3, %p50_p0  ;;  %p218_p7 = scmp.lt.s32.totalorder %s1772_s29, 3 }
  0x16   : > { %s2759_s3 = sld [smem:[#allocation25_spill]]  ;;  %s1774_s23 = smov [#allocation10]  }
  0x17   : > { %p1874_p8 = pnand %p1269_p5, %p218_p7  ;;  %s2761_s2 = sld [smem:[#allocation24_spill]] }
  0x18   : > { %s2762_s4 = sld [smem:[#allocation26_spill]]  ;;  %s1775_s24 = smov [#allocation9]  }
  0x19   : > { %p1422_p10 = pneg %p1874_p8  ;;  %s2763_s6 = sld [smem:[#allocation27_spill]] }
  0x1a   : > { %s1776_s25 = smov [#allocation12]   ;;  %s1777_s30 = smov [#allocation13]  }
  0x1b   : > { %p1423_p11 = pnand %p1422_p10, %p51_p1  ;;  %s1893_s10 = sadd.s32 1, %s1772_s29  }
  0x1c   : > { %s240_s12 = sshll.u32 %s2759_s3, 4  ;;  %s34_s11 = ssub.s32 %s1772_s29, %s1893_s10  ;;  %s241_s12 = int_to_ptr.vmem [resolvable:$true] %s240_s12 }
  0x1d   : > { %s230_s16 = sshll.u32 %s2761_s2, 4  ;;  %p35_p12 = scmp.eq.s32.totalorder %s34_s11, 0  ;;  %s231_s16 = int_to_ptr.vmem [resolvable:$true] %s230_s16 }
  0x1e   : > { %s250_s19 = sshll.u32 %s2762_s4, 4  ;;  %s37_s14 = sadd.s32 1, %s1768_s28  ;;  %s251_s19 = int_to_ptr.vmem [resolvable:$true] %s250_s19 }
  0x1f   : > { %s263_s22 = sshll.u32 %s2763_s6, 4  ;;  %p44_p13 = scmp.ne.s32.totalorder %s1768_s28, %s1764_s27  ;;  %s264_s22 = int_to_ptr.vmem [resolvable:$true] %s263_s22 }
  0x20   : > { %1428 = dma.vmem_to_smem (!%p1423_p11), %s241_s12, 16, %s1774_s23, [#allocation11]  }
  0x21   : > { %1425 = dma.vmem_to_smem (!%p1423_p11), %s231_s16, 16, %s1775_s24, [#allocation6]  }
  0x22   : > { %1431 = dma.vmem_to_smem (!%p1423_p11), %s251_s19, 16, %s1776_s25, [#allocation11]  }
  0x23   : > { %1434 = dma.vmem_to_smem (!%p1423_p11), %s264_s22, 16, %s1777_s30, [#allocation14]  }
  0x24   : > { %p45_p0 = scmp.eq.s32.totalorder %s1772_s29, 0  ;;  %p1906_p5 = por %p205_p2, %p44_p13 }
  0x25   : > { %s1902_s12 = scalar_select %p35_p12, %s1768_s28, %s37_s14  }
  0x26   : > { %p46_p3 = por %p45_p0, %p44_p13  ;;  %p1450_p7 = scmp.lt.s32.totalorder %s1772_s29, 2 }
  0x27   : > { %2764 = sst [smem:[#allocation22_spill]] %s1902_s12  ;;  %s1912_s16 = sand.u32 1, %s1768_s28  }
  0x28   : > { %s1275_s17 = sshll.u32 %s1912_s16, 5  ;;  %s2751_s18 = sshll.u32 %s1772_s29, 3 }
  0x29   : > { %s2766_s0 = sld [smem:[#allocation23_spill]]  ;;  %s278_s22 = scalar_lea.vmem [#allocation3], %s1275_s17 }
  0x2a   : > { %s285_s23 = sshll.u32 %s278_s22, 4  ;;  %p1921_p2 = pnand %p1450_p7, %p46_p3  ;;  %s286_s23 = int_to_ptr.vmem [resolvable:$true] %s285_s23 }
  0x2b   : > { %s275_s30 = scalar_lea.sflag [#allocation4], %s1912_s16 }
  0x2c   : > { %p1634_p11 = pneg %p1921_p2 }
  0x2f   : > { %s282_s21 = scalar_lea.hbm %s2766_s0, %s2751_s18  ;;  %s1637_s20 = scalar_lea.hbm %s2766_s0, 64 }
  0x30   : > { %s283_s24 = sshll.u32 %s282_s21, 4  ;;  %s284_s24 = int_to_ptr.hbm [resolvable:$true] %s283_s24 }
  0x31   : > { %s1630_s11 = sshra.s32 %s284_s24, 4  ;;  %s1631_s11 = int_to_ptr.hbm [resolvable:$true] %s1630_s11 }
  0x32   : > { %s1632_s14 = scalar_lea.hbm %s1631_s11, 32  ;;  %p1638_p0 = scmp.lt.s32.totalorder %s1631_s11, %s2766_s0 }
  0x33   : > { %p1633_p10 = scmp.ne.s32.totalorder %s1631_s11, %s1632_s14  ;;  %p1639_p3 = scmp.lt.s32.totalorder %s1637_s20, %s1632_s14 }
  0x35   : > { %p1635_p12 = pnand %p1634_p11, %p1633_p10  ;;  %p1640_p7 = por %p1639_p3, %p1638_p0 }
  0x37   : > { %p1636_p13 = pneg %p1635_p12 }
  0x39   : > { %p1641_p9 = pnand %p1640_p7, %p1636_p13 }
  0x3b   : > { %1644 = shalt.err (!%p1641_p9)
}
  0x3c   : > { %s1778_s18 = smov 256   ;;  %s1779_s2 = smov 128  }
  0x3d   : > { %s1780_s3 = smov 8   ;;  %s1277_s17 = sshll.u32 %s1912_s16, 3 }
  0x3e   : > { %1438 = dma.hbm_to_vmem [thread:$0]  (!%p1921_p2), %s284_s24, 512, %s286_s23, %s275_s30, %s1778_s18, %s1779_s2, %s1780_s3  }
  0x3f   : > { %s2768_s19 = sshll.u32 %s1772_s29, 3  ;;  %s299_s20 = scalar_lea.vmem [#allocation7], %s1277_s17 }
  0x40   : > { %s303_s11 = scalar_lea.hbm %s2744_s1, %s2768_s19  ;;  %s307_s21 = sshll.u32 %s299_s20, 4  ;;  %s308_s21 = int_to_ptr.vmem [resolvable:$true] %s307_s21 }
  0x41   : > { %s305_s14 = sshll.u32 %s303_s11, 4  ;;  %s296_s22 = scalar_lea.sflag [#allocation8], %s1912_s16  ;;  %s306_s14 = int_to_ptr.hbm [resolvable:$true] %s305_s14 }
  0x42   : > { %s1660_s0 = sshra.s32 %s306_s14, 4  ;;  %s1667_s18 = scalar_lea.hbm %s2744_s1, 16  ;;  %s1661_s0 = int_to_ptr.hbm [resolvable:$true] %s1660_s0 }
  0x43   : > { %s1662_s12 = scalar_lea.hbm %s1661_s0, 8  ;;  %p1668_p13 = scmp.lt.s32.totalorder %s1661_s0, %s2744_s1 }
  0x44   : > { %p1663_p9 = scmp.ne.s32.totalorder %s1661_s0, %s1662_s12  ;;  %p1669_p0 = scmp.lt.s32.totalorder %s1667_s18, %s1662_s12 }
  0x46   : > { %p1665_p10 = pnand %p1663_p9, %p1634_p11  ;;  %p1670_p3 = por %p1669_p0, %p1668_p13 }
  0x48   : > { %p1666_p12 = pneg %p1665_p10 }
  0x4a   : > { %p1671_p7 = pnand %p1670_p3, %p1666_p12 }
  0x4c   : > { %1674 = shalt.err (!%p1671_p7)
}
  0x4d   : > { %1441 = dma.hbm_to_vmem [thread:$0]  (!%p1921_p2), %s306_s14, 128, %s308_s21, %s296_s22  }
  0x4e   : > { %316 = sbr.rel (%p1874_p8) target bundleno = 267 (0x10b), region = 48  ;;  %s1960_s16 = sand.u32 (!%p1874_p8), 1, %s1764_s27  }
  0x4f   : > { %s1280_s23 = sshll.u32 (!%p1874_p8), %s1960_s16, 5  ;;  %s319_s24 = scalar_lea.sflag (!%p1874_p8), [#allocation4], %s1960_s16 }
  0x50   : > { %s1964_s30 = scalar_lea.vmem (!%p1874_p8), [#allocation3], %s1280_s23 }
  0x53   : > { %1735 = dma.done.wait (%p1861_p4), %s319_s24, 512  }
  0x54   : > { %1737 = vsyncadd (%p1861_p4), %s319_s24, 4294966784  ;;  %s1281_s0 = sshll.u32 %s1960_s16, 3  ;;  %s329_s13 = scalar_lea.sflag [#allocation8], %s1960_s16 }
  0x55   : > { %s1974_s12 = scalar_lea.vmem [#allocation7], %s1281_s0 }
  0x56   : > { %1739 = dma.done.wait (%p1861_p4), %s329_s13, 128  }
  0x57   : > { %1741 = vsyncadd (%p1861_p4), %s329_s13, 4294967168 }
  0x58   : > { %1743 = dma.done.wait (%p51_p1), [#allocation6], 16  }
  0x59   : > { %1745 = vsyncadd (%p51_p1), [#allocation6], 4294967280 }
  0x5a   : > { %1747 = dma.done.wait (%p51_p1), [#allocation11], 32  }
  0x5b   : > { %1749 = vsyncadd (%p51_p1), [#allocation11], 4294967264 }
  0x5c   : > { %1751 = dma.done.wait (%p51_p1), [#allocation14], 16  }
  0x5d   : > { %1753 = vsyncadd (%p51_p1), [#allocation14], 4294967280 }
  0x5e   : > { %358 = sfence }
  0x5f   : > { %v1993_v0 = vld [vmem:[%s1964_s30 + $0x10] sm:$0xff]  ;;  %s392_s8 = sld [smem:[#allocation9]]  ;;  %v1781_v8 = vmov 920167782   ;;  %v1782_v10 = vmov 1326507024  }
  0x60   : > { %v806_v1 = vand.u32 2139095040, %v1993_v0  ;;  %s1288_s25 = sld [smem:[#allocation9 + $0x1]]  ;;  %v803_v12 = vand.u32 2147483647, %v1993_v0  ;;  %v2011_v14 = vld [vmem:[%s1964_s30] sm:$0xff] }
  0x61   : > { %s1998_s17 = sld [smem:[#allocation10]]  ;;  %v1783_v17 = vmov 2475754826   ;;  %v1784_v19 = vmov 2131351028  }
  0x62   : > { %v807_v2 = vshrl.u32 %v806_v1, 23  ;;  %s2000_s19 = sld [smem:[#allocation10 + $0x1]]  ;;  %v1785_v22 = vmov 2102212464   ;;  %v810_v29 = vand.u32 8388607, %v803_v12 }
  0x63   : > { %s2002_s11 = sld [smem:[#allocation9 + $0x2]]  ;;  %v1786_v32 = vmov 683565275  }
  0x64   : > { %v1389_v3 = vadd.s32 4294967169, %v807_v2  ;;  %s2015_s14 = sld [smem:[#allocation10 + $0x2]]  ;;  %v811_v40 = vor.u32 8388608, %v810_v29 }
  0x65   : > { %v393_v15 = vstv %s392_s8  ;;  %s2024_s20 = sld [smem:[#allocation9 + $0x3]] }
  0x66   : > { %v813_v4 = vadd.s32 1, %v1389_v3  ;;  %v404_v16 = vstv %s1288_s25  ;;  %v394_v27 = vmul.f32 %v393_v15, %v2011_v14  ;;  %s2037_s21 = sld [smem:[#allocation10 + $0x3]]  ;;  %v2073_v50 = vshll.u32 %v811_v40, 8 }
  0x67   : > { %v396_v28 = vstv %s1998_s17  ;;  %v405_v30 = vmul.f32 %v404_v16, %v2011_v14  ;;  %s2043_s22 = sld [smem:[#allocation9 + $0x4]] }
  0x68   : > { %vm814_vm0 = vcmp.gt.s32.totalorder %v813_v4, 0  ;;  %v407_v31 = vstv %s2000_s19  ;;  %s2049_s2 = sld [smem:[#allocation9 + $0x5]]  ;;  %v397_v41 = vadd.f32 %v396_v28, %v394_v27  ;;  %v852_v60 = vand.u32 65535, %v2073_v50 }
  0x69   : > { %v815_v5 = vsel %vm814_vm0, %v813_v4, 0  ;;  %v415_v35 = vstv %s2002_s11  ;;  %s2051_s3 = sld [smem:[#allocation12]]  ;;  %v408_v42 = vadd.f32 %v407_v31, %v405_v30 }
  0x6a   : > { %v817_v6 = vand.u32 31, %v815_v5  ;;  %v2008_v13 = vshrl.u32 %v815_v5, 5  ;;  %v416_v43 = vmul.f32 %v415_v35, %v2011_v14  ;;  %s2056_s18 = sld [smem:[#allocation12 + $0x1]]  ;;  %v418_v48 = vstv %s2015_s14 }
  0x6b   : > { %v426_v49 = vstv %s2024_s20  ;;  %s2069_s4 = sld [smem:[#allocation10 + $0x4]]  ;;  %1502 = vtanh.f32 %v397_v41 }
  0x6c   : > { %v1996_v7 = vsub.s32 32, %v817_v6  ;;  %v832_v9 = vshll.u32 %v1781_v8, %v817_v6  ;;  %v823_v18 = vshll.u32 %v1783_v17, %v817_v6  ;;  %v826_v20 = vshll.u32 %v1784_v19, %v817_v6  ;;  %s2071_s6 = sld [smem:[#allocation10 + $0x5]] }
  0x6d   : > { %v829_v24 = vshll.u32 %v1785_v22, %v817_v6  ;;  %vm838_vm1 = vcmp.lt.s32.totalorder %v2008_v13, 4  ;;  %v820_v33 = vshll.u32 %v1786_v32, %v817_v6  ;;  %vm835_vm2 = vcmp.lt.s32.totalorder %v2008_v13, 1  ;;  %s2087_s23 = sld [smem:[#allocation9 + $0x6]] }
  0x6e   : > { %v833_v11 = vshrl.u32 %v1782_v10, %v1996_v7  ;;  %v824_v21 = vshrl.u32 %v1784_v19, %v1996_v7  ;;  %v827_v23 = vshrl.u32 %v1785_v22, %v1996_v7  ;;  %v830_v25 = vshrl.u32 %v1781_v8, %v1996_v7  ;;  %s2089_s24 = sld [smem:[#allocation12 + $0x2]] }
  0x6f   : > { %v821_v34 = vshrl.u32 %v1783_v17, %v1996_v7  ;;  %vm837_vm3 = vcmp.lt.s32.totalorder %v2008_v13, 3  ;;  %vm836_vm4 = vcmp.lt.s32.totalorder %v2008_v13, 2  ;;  %1504 = vtanh.f32 %v408_v42  ;;  %s2093_s13 = sld [smem:[#allocation12 + $0x3]] }
  0x70   : > { %v834_v26 = vor.u32 %v833_v11, %v832_v9  ;;  %v2039_v36 = vor.u32 %v824_v21, %v823_v18  ;;  %v2041_v37 = vor.u32 %v827_v23, %v826_v20  ;;  %v831_v38 = vor.u32 %v830_v25, %v829_v24  ;;  %s2101_s8 = sld [smem:[#allocation10 + $0x6]] }
  0x71   : > { %v2054_v44 = vor.u32 %v821_v34, %v820_v33  ;;  %v419_v54 = vadd.f32 %v418_v48, %v416_v43  ;;  %v427_v55 = vmul.f32 %v426_v49, %v2011_v14  ;;  %v429_v56 = vstv %s2037_s21  ;;  %s2105_s25 = sld [smem:[#allocation9 + $0x7]]  ;;  %v1503_v3 = vpop.eup %1502 }
  0x72   : > { %v848_v39 = vsel %vm838_vm1, %v834_v26, 1326507024  ;;  %v844_v45 = vsel %vm838_vm1, %v831_v38, 920167782  ;;  %v847_v46 = vsel %vm835_vm2, %v2039_v36, %v2041_v37  ;;  %v437_v57 = vstv %s2043_s22  ;;  %s2111_s17 = sld [smem:[#allocation10 + $0x7]] }
  0x73   : > { %v849_v47 = vsel %vm837_vm3, %v831_v38, %v848_v39  ;;  %v843_v51 = vsel %vm835_vm2, %v2054_v44, %v2039_v36  ;;  %v845_v52 = vsel %vm837_vm3, %v2041_v37, %v844_v45  ;;  %v448_v58 = vstv %s2049_s2  ;;  %s2116_s19 = sld [smem:[#allocation9 + $0x8]] }
  0x74   : > { %v2084_v53 = vsel %vm836_vm4, %v847_v46, %v849_v47  ;;  %v846_v59 = vsel %vm836_vm4, %v843_v51, %v845_v52  ;;  %v399_v62 = vstv %s2051_s3  ;;  %v410_v63 = vstv %s2056_s18  ;;  %s2122_s11 = sld [smem:[#allocation12 + $0x4]] }
  0x75   : > { %v855_v61 = vshrl.u32 %v2084_v53, 16  ;;  %1506 = vtanh.f32 %v419_v54  ;;  %v430_v1 = vadd.f32 %v429_v56, %v427_v55  ;;  %v438_v2 = vmul.f32 %v437_v57, %v2011_v14  ;;  %v1505_v11 = vpop.eup %1504  ;;  %s2129_s14 = sld [smem:[#allocation10 + $0x8]] }
  0x76   : > { %v440_v4 = vstv %s2069_s4  ;;  %v449_v5 = vmul.f32 %v448_v58, %v2011_v14  ;;  %v853_v6 = vshrl.u32 %v2073_v50, 16  ;;  %v877_v9 = vshrl.u32 %v846_v59, 16  ;;  %s2134_s20 = sld [smem:[#allocation9 + $0x9]] }
  0x77   : > { %v451_v15 = vstv %s2071_s6  ;;  %v854_v16 = vand.u32 65535, %v2084_v53  ;;  %v2114_v18 = vmul.u32 %v855_v61, %v852_v60  ;;  %v876_v20 = vand.u32 65535, %v846_v59  ;;  %s2138_s21 = sld [smem:[#allocation12 + $0x5]] }
  0x78   : > { %1508 = vtanh.f32 %v430_v1  ;;  %v441_v21 = vadd.f32 %v440_v4, %v438_v2  ;;  %v459_v23 = vstv %s2087_s23  ;;  %v2119_v24 = vmul.u32 %v877_v9, %v852_v60  ;;  %s2148_s22 = sld [smem:[#allocation10 + $0x9]] }
  0x79   : > { %v400_v25 = vmul.f32 %v1503_v3, %v399_v62  ;;  %v411_v26 = vmul.f32 %v1505_v11, %v410_v63  ;;  %v421_v27 = vstv %s2089_s24  ;;  %v452_v28 = vadd.f32 %v451_v15, %v449_v5  ;;  %s2153_s2 = sld [smem:[#allocation9 + $0xa]] }
  0x7a   : > { %v856_v30 = vmul.u32 %v854_v16, %v852_v60  ;;  %v2124_v31 = vmul.u32 %v854_v16, %v853_v6  ;;  %v860_v33 = vshll.u32 %v2114_v18, 16  ;;  %v878_v34 = vmul.u32 %v876_v20, %v852_v60  ;;  %s2160_s3 = sld [smem:[#allocation12 + $0x6]] }
  0x7b   : > { %v1507_v29 = vpop.eup %1506  ;;  %v432_v35 = vstv %s2093_s13  ;;  %v460_v38 = vmul.f32 %v459_v23, %v2011_v14  ;;  %v882_v39 = vshll.u32 %v2119_v24, 16  ;;  %1510 = vtanh.f32 %v441_v21  ;;  %s2165_s18 = sld [smem:[#allocation10 + $0xa]] }
  0x7c   : > { %v462_v40 = vstv %s2101_s8  ;;  %v470_v41 = vstv %s2105_s25  ;;  %v2136_v42 = vmul.u32 %v876_v20, %v853_v6  ;;  %v412_v43 = vadd.f32 %v411_v26, %v400_v25  ;;  %s2170_s4 = sld [smem:[#allocation9 + $0xb]] }
  0x7d   : > { %v422_v45 = vmul.f32 %v1507_v29, %v421_v27  ;;  %1512 = vtanh.f32 %v452_v28  ;;  %v862_v47 = vshll.u32 %v2124_v31, 16  ;;  %vm2141_vm5 = vc.u32 %v856_v30, %v860_v33  ;;  %s2175_s6 = sld [smem:[#allocation12 + $0x7]] }
  0x7e   : > { %v1509_v46 = vpop.eup %1508  ;;  %v866_v49 = vadd.s32 %v860_v33, %v856_v30  ;;  %vm886_vm6 = vc.u32 %v878_v34, %v882_v39  ;;  %v463_v51 = vadd.f32 %v462_v40, %v460_v38  ;;  %v471_v52 = vmul.f32 %v470_v41, %v2011_v14  ;;  %s2180_s23 = sld [smem:[#allocation10 + $0xb]] }
  0x7f   : > { %v473_v53 = vstv %s2111_s17  ;;  %v481_v54 = vstv %s2116_s19  ;;  %v859_v55 = vmul.u32 %v855_v61, %v853_v6  ;;  %v881_v56 = vmul.u32 %v877_v9, %v853_v6  ;;  %s2184_s24 = sld [smem:[#allocation9 + $0xc]] }
  0x80   : > { %v884_v57 = vshll.u32 %v2136_v42, 16  ;;  %v2151_v58 = vadd.s32 %v882_v39, %v878_v34  ;;  %v423_v59 = vadd.f32 %v422_v45, %v412_v43  ;;  %v433_v60 = vmul.f32 %v1509_v46, %v432_v35  ;;  %s2187_s13 = sld [smem:[#allocation12 + $0x8]] }
  0x81   : > { %v1787_v62 = vmov 0   ;;  %v1511_v2 = vpop.eup %1510  ;;  %v443_v61 = vstv %s2122_s11  ;;  %vm868_vm7 = vc.u32 %v866_v49, %v862_v47  ;;  %1514 = vtanh.f32 %v463_v51  ;;  %s2196_s8 = sld [smem:[#allocation10 + $0xc]] }
  0x82   : > { %v865_v63 = vsel %vm2141_vm5, 1, %v1787_v62  ;;  %v887_v1 = vsel %vm886_vm6, 1, %v1787_v62  ;;  %v474_v4 = vadd.f32 %v473_v53, %v471_v52  ;;  %v482_v5 = vmul.f32 %v481_v54, %v2011_v14  ;;  %s2201_s25 = sld [smem:[#allocation9 + $0xd]] }
  0x83   : > { %v1513_v3 = vpop.eup %1512  ;;  %v484_v6 = vstv %s2129_s14  ;;  %v492_v9 = vstv %s2134_s20  ;;  %v867_v11 = vadd.s32 %v865_v63, %v859_v55  ;;  %v889_v15 = vadd.s32 %v887_v1, %v881_v56  ;;  %s2204_s17 = sld [smem:[#allocation12 + $0x9]] }
  0x84   : > { %vm890_vm8 = vc.u32 %v2151_v58, %v884_v57  ;;  %v434_v16 = vadd.f32 %v433_v60, %v423_v59  ;;  %v444_v20 = vmul.f32 %v1511_v2, %v443_v61  ;;  %v869_v21 = vsel %vm868_vm7, 1, %v1787_v62  ;;  %s2213_s19 = sld [smem:[#allocation10 + $0xd]] }
  0x85   : > { %v891_v23 = vsel %vm890_vm8, 1, %v1787_v62  ;;  %v454_v25 = vstv %s2138_s21  ;;  %1516 = vtanh.f32 %v474_v4  ;;  %v485_v26 = vadd.f32 %v484_v6, %v482_v5  ;;  %s2224_s11 = sld [smem:[#allocation9 + $0xe]] }
  0x86   : > { %v493_v27 = vmul.f32 %v492_v9, %v2011_v14  ;;  %v883_v28 = vshrl.u32 %v2119_v24, 16  ;;  %v495_v29 = vstv %s2148_s22  ;;  %v861_v30 = vshrl.u32 %v2114_v18, 16  ;;  %s2227_s14 = sld [smem:[#allocation12 + $0xa]] }
  0x87   : > { %v871_v33 = vadd.s32 %v869_v21, %v867_v11  ;;  %v893_v34 = vadd.s32 %v891_v23, %v889_v15  ;;  %v1515_v35 = vpop.eup %1514  ;;  %v445_v38 = vadd.f32 %v444_v20, %v434_v16  ;;  %v455_v39 = vmul.f32 %v1513_v3, %v454_v25  ;;  %s2232_s20 = sld [smem:[#allocation10 + $0xe]] }
  0x88   : > { %v503_v40 = vstv %s2153_s2  ;;  %v465_v41 = vstv %s2160_s3  ;;  %v819_v24 = vshrl.u32 %v1786_v32, %v1996_v7  ;;  %v496_v43 = vadd.f32 %v495_v29, %v493_v27  ;;  %s2238_s21 = sld [smem:[#allocation9 + $0xf]] }
  0x89   : > { %v840_v18 = vsel %vm838_vm1, %v2041_v37, 2102212464  ;;  %v885_v45 = vshrl.u32 %v2136_v42, 16  ;;  %v894_v46 = vadd.s32 %v893_v34, %v883_v28  ;;  %1518 = vtanh.f32 %v485_v26  ;;  %s2241_s22 = sld [smem:[#allocation12 + $0xb]] }
  0x8a   : > { %v504_v47 = vmul.f32 %v503_v40, %v2011_v14  ;;  %v863_v48 = vshrl.u32 %v2124_v31, 16  ;;  %v872_v49 = vadd.s32 %v871_v33, %v861_v30  ;;  %v456_v52 = vadd.f32 %v455_v39, %v445_v38  ;;  %s2244_s2 = sld [smem:[#allocation12 + $0xc]] }
  0x8b   : > { %v1517_v51 = vpop.eup %1516  ;;  %v466_v7 = vmul.f32 %v1515_v35, %v465_v41  ;;  %v506_v53 = vstv %s2165_s18  ;;  %v514_v54 = vstv %s2170_s4  ;;  %v476_v37 = vstv %s2175_s6  ;;  %s2249_s3 = sld [smem:[#allocation10 + $0xf]] }
  0x8c   : > { %1520 = vtanh.f32 %v496_v43  ;;  %v839_v55 = vsel %vm835_vm2, %v819_v24, %v2054_v44  ;;  %v841_v31 = vsel %vm837_vm3, %v2039_v36, %v840_v18  ;;  %v895_v56 = vadd.s32 %v894_v46, %v885_v45  ;;  %s2252_s18 = sld [smem:[#allocation9 + $0x10]] }
  0x8d   : > { %v507_v59 = vadd.f32 %v506_v53, %v504_v47  ;;  %v515_v60 = vmul.f32 %v514_v54, %v2011_v14  ;;  %v2215_v63 = vadd.s32 %v872_v49, %v863_v48  ;;  %v2220_v1 = vadd.s32 %v2151_v58, %v884_v57  ;;  %s2255_s4 = sld [smem:[#allocation12 + $0xd]]  ;;  %v2273_v54 = vld [vmem:[%s1964_s30 + $0x18] sm:$0xff] }
  0x8e   : > { %v467_v2 = vadd.f32 %v466_v7, %v456_v52  ;;  %v477_v61 = vmul.f32 %v1517_v51, %v476_v37  ;;  %v517_v44 = vstv %s2180_s23  ;;  %v525_v3 = vstv %s2184_s24  ;;  %s2260_s6 = sld [smem:[#allocation10 + $0x10]] }
  0x8f   : > { %v1519_v36 = vpop.eup %1518  ;;  %v487_v4 = vstv %s2187_s13  ;;  %v842_v5 = vsel %vm836_vm4, %v839_v55, %v841_v31  ;;  %v899_v42 = vadd.s32 1, %v895_v56  ;;  %1522 = vtanh.f32 %v507_v59  ;;  %s2263_s23 = sld [smem:[#allocation9 + $0x11]] }
  0x90   : > { %v518_v57 = vadd.f32 %v517_v44, %v515_v60  ;;  %v526_v58 = vmul.f32 %v525_v3, %v2011_v14  ;;  %vm898_vm9 = vc.u32 %v2215_v63, %v2220_v1  ;;  %v478_v9 = vadd.f32 %v477_v61, %v467_v2  ;;  %s2267_s24 = sld [smem:[#allocation12 + $0xe]] }
  0x91   : > { %v488_v11 = vmul.f32 %v1519_v36, %v487_v4  ;;  %v528_v15 = vstv %s2196_s8  ;;  %v536_v16 = vstv %s2201_s25  ;;  %v498_v13 = vstv %s2204_s17  ;;  %s2275_s13 = sld [smem:[#allocation10 + $0x11]] }
  0x92   : > { %v1521_v6 = vpop.eup %1520  ;;  %v896_v20 = vmul.u32 %v2073_v50, %v842_v5  ;;  %v900_v21 = vsel %vm898_vm9, %v899_v42, %v895_v56  ;;  %1524 = vtanh.f32 %v518_v57  ;;  %v529_v23 = vadd.f32 %v528_v15, %v526_v58  ;;  %s2278_s8 = sld [smem:[#allocation9 + $0x12]] }
  0x93   : > { %v537_v25 = vmul.f32 %v536_v16, %v2011_v14  ;;  %v489_v26 = vadd.f32 %v488_v11, %v478_v9  ;;  %v499_v27 = vmul.f32 %v1521_v6, %v498_v13  ;;  %v539_v28 = vstv %s2213_s19  ;;  %s2281_s25 = sld [smem:[#allocation12 + $0xf]] }
  0x94   : > { %v547_v29 = vstv %s2224_s11  ;;  %v509_v33 = vstv %s2227_s14  ;;  %v901_v50 = vadd.s32 %v900_v21, %v896_v20  ;;  %1526 = vtanh.f32 %v529_v23  ;;  %s2286_s17 = sld [smem:[#allocation9 + $0x13]] }
  0x95   : > { %v1523_v30 = vpop.eup %1522  ;;  %v540_v34 = vadd.f32 %v539_v28, %v537_v25  ;;  %v548_v35 = vmul.f32 %v547_v29, %v2011_v14  ;;  %v500_v38 = vadd.f32 %v499_v27, %v489_v26  ;;  %v550_v40 = vstv %s2232_s20  ;;  %s2289_s19 = sld [smem:[#allocation10 + $0x12]] }
  0x96   : > { %v510_v39 = vmul.f32 %v1523_v30, %v509_v33  ;;  %v558_v41 = vstv %s2238_s21  ;;  %v520_v43 = vstv %s2241_s22  ;;  %v902_v18 = vadd.s32 536870912, %v901_v50  ;;  %s2292_s11 = sld [smem:[#allocation12 + $0x10]] }
  0x97   : > { %1528 = vtanh.f32 %v540_v34  ;;  %v551_v45 = vadd.f32 %v550_v40, %v548_v35  ;;  %v559_v46 = vmul.f32 %v558_v41, %v2011_v14  ;;  %v561_v49 = vstv %s2249_s3  ;;  %s2297_s14 = sld [smem:[#allocation10 + $0x13]] }
  0x98   : > { %v1525_v24 = vpop.eup %1524  ;;  %v511_v47 = vadd.f32 %v510_v39, %v500_v38  ;;  %v531_v52 = vstv %s2244_s2  ;;  %v569_v7 = vstv %s2252_s18  ;;  %v2270_v53 = vshrl.u32 %v902_v18, 30  ;;  %s2301_s20 = sld [smem:[#allocation9 + $0x14]] }
  0x99   : > { %v521_v48 = vmul.f32 %v1525_v24, %v520_v43  ;;  %1530 = vtanh.f32 %v551_v45  ;;  %v562_v37 = vadd.f32 %v561_v49, %v559_v46  ;;  %v570_v56 = vmul.f32 %v569_v7, %v2011_v14  ;;  %s2304_s21 = sld [smem:[#allocation12 + $0x11]] }
  0x9a   : > { %v1527_v51 = vpop.eup %1526  ;;  %v542_v60 = vstv %s2255_s4  ;;  %v572_v2 = vstv %s2260_s6  ;;  %v904_v61 = vshll.u32 %v2270_v53, 30  ;;  %v963_v44 = vand.u32 2139095040, %v2273_v54  ;;  %s2307_s22 = sld [smem:[#allocation12 + $0x12]] }
  0x9b   : > { %v522_v55 = vadd.f32 %v521_v48, %v511_v47  ;;  %v532_v31 = vmul.f32 %v1527_v51, %v531_v52  ;;  %1532 = vtanh.f32 %v562_v37  ;;  %v580_v3 = vstv %s2263_s23  ;;  %s2312_s2 = sld [smem:[#allocation12 + $0x13]] }
  0x9c   : > { %v573_v5 = vadd.f32 %v572_v2, %v570_v56  ;;  %v553_v57 = vstv %s2267_s24  ;;  %v2294_v58 = vsub.s32 %v901_v50, %v904_v61  ;;  %v964_v6 = vshrl.u32 %v963_v44, 23  ;;  %s2315_s3 = sld [smem:[#allocation10 + $0x14]] }
  0x9d   : > { %v1529_v59 = vpop.eup %1528  ;;  %v533_v36 = vadd.f32 %v532_v31, %v522_v55  ;;  %v581_v9 = vmul.f32 %v580_v3, %v2011_v14  ;;  %v583_v11 = vstv %s2275_s13  ;;  %v591_v13 = vstv %s2278_s8  ;;  %s2322_s18 = sld [smem:[#allocation9 + $0x15]] }
  0x9e   : > { %v543_v4 = vmul.f32 %v1529_v59, %v542_v60  ;;  %1534 = vtanh.f32 %v573_v5  ;;  %v564_v21 = vstv %s2281_s25  ;;  %v907_v23 = vsub.s32 0, %v2294_v58  ;;  %s2336_s4 = sld [smem:[#allocation10 + $0x15]] }
  0x9f   : > { %v1531_v42 = vpop.eup %1530  ;;  %v1393_v25 = vadd.s32 4294967169, %v964_v6  ;;  %v584_v26 = vadd.f32 %v583_v11, %v581_v9  ;;  %v602_v27 = vstv %s2286_s17  ;;  %vm906_vm10 = vcmp.lt.s32.totalorder %v2294_v58, 0  ;;  %s2340_s6 = sld [smem:[#allocation9 + $0x16]] }
  0xa0   : > { %v544_v15 = vadd.f32 %v543_v4, %v533_v36  ;;  %v554_v16 = vmul.f32 %v1531_v42, %v553_v57  ;;  %v592_v28 = vmul.f32 %v591_v13, %v2011_v14  ;;  %v594_v33 = vstv %s2289_s19  ;;  %s2372_s23 = sld [smem:[#allocation10 + $0x16]] }
  0xa1   : > { %v1533_v20 = vpop.eup %1532  ;;  %v603_v50 = vmul.f32 %v602_v27, %v2011_v14  ;;  %v908_v34 = vsel %vm906_vm10, %v907_v23, %v2294_v58  ;;  %v960_v35 = vand.u32 2147483647, %v2273_v54  ;;  %v970_v38 = vadd.s32 1, %v1393_v25  ;;  %s2406_s24 = sld [smem:[#allocation9 + $0x17]] }
  0xa2   : > { %v555_v29 = vadd.f32 %v554_v16, %v544_v15  ;;  %v565_v30 = vmul.f32 %v1533_v20, %v564_v21  ;;  %v575_v40 = vstv %s2292_s11  ;;  %1536 = vtanh.f32 %v584_v26  ;;  %s2413_s13 = sld [smem:[#allocation10 + $0x17]] }
  0xa3   : > { %v605_v41 = vstv %s2297_s14  ;;  %v595_v24 = vadd.f32 %v594_v33, %v592_v28  ;;  %v613_v18 = vstv %s2301_s20  ;;  %v909_v45 = vclz %v908_v34  ;;  %s2419_s8 = sld [smem:[#allocation9 + $0x18]] }
  0xa4   : > { %v1535_v39 = vpop.eup %1534  ;;  %v566_v43 = vadd.f32 %v565_v30, %v555_v29  ;;  %v606_v47 = vadd.f32 %v605_v41, %v603_v50  ;;  %v967_v48 = vand.u32 8388607, %v960_v35  ;;  %vm971_vm11 = vcmp.gt.s32.totalorder %v970_v38, 0  ;;  %s2422_s25 = sld [smem:[#allocation12 + $0x14]] }
  0xa5   : > { %v576_v46 = vmul.f32 %v1535_v39, %v575_v40  ;;  %v586_v49 = vstv %s2304_s21  ;;  %v972_v51 = vsel %vm971_vm11, %v970_v38, 0  ;;  %1538 = vtanh.f32 %v595_v24  ;;  %s2427_s17 = sld [smem:[#allocation12 + $0x15]] }
  0xa6   : > { %v597_v52 = vstv %s2307_s22  ;;  %v608_v7 = vstv %s2312_s2  ;;  %v614_v37 = vmul.f32 %v613_v18, %v2011_v14  ;;  %v616_v31 = vstv %s2315_s3  ;;  %s2434_s19 = sld [smem:[#allocation10 + $0x18]] }
  0xa7   : > { %v2334_v56 = vadd.s32 %v2220_v1, %v2215_v63  ;;  %v1390_v59 = vadd.s32 4294967294, %v909_v45  ;;  %v974_v60 = vand.u32 31, %v972_v51  ;;  %v577_v2 = vadd.f32 %v576_v46, %v566_v43  ;;  %s2442_s11 = sld [smem:[#allocation9 + $0x19]] }
  0xa8   : > { %v1537_v55 = vpop.eup %1536  ;;  %1540 = vtanh.f32 %v606_v47  ;;  %v968_v61 = vor.u32 8388608, %v967_v48  ;;  %v2338_v44 = vshrl.u32 %v972_v51, 5  ;;  %v624_v5 = vstv %s2322_s18  ;;  %s2445_s14 = sld [smem:[#allocation12 + $0x16]] }
  0xa9   : > { %v2342_v3 = vsub.s32 32, %v974_v60  ;;  %v977_v36 = vshll.u32 %v1786_v32, %v974_v60  ;;  %v980_v4 = vshll.u32 %v1783_v17, %v974_v60  ;;  %v983_v63 = vshll.u32 %v1784_v19, %v974_v60  ;;  %s2457_s20 = sld [smem:[#allocation10 + $0x19]] }
  0xaa   : > { %v587_v1 = vmul.f32 %v1537_v55, %v586_v49  ;;  %v986_v42 = vshll.u32 %v1785_v22, %v974_v60  ;;  %v989_v57 = vshll.u32 %v1781_v8, %v974_v60  ;;  %vm1391_vm12 = vcmp.lt.s32.totalorder %v1390_v59, 0  ;;  %s2461_s21 = sld [smem:[#allocation9 + $0x1a]] }
  0xab   : > { %v978_v6 = vshrl.u32 %v1783_v17, %v2342_v3  ;;  %v981_v9 = vshrl.u32 %v1784_v19, %v2342_v3  ;;  %v984_v11 = vshrl.u32 %v1785_v22, %v2342_v3  ;;  %v1539_v15 = vpop.eup %1538  ;;  %v987_v16 = vshrl.u32 %v1781_v8, %v2342_v3  ;;  %s2470_s22 = sld [smem:[#allocation12 + $0x17]] }
  0xac   : > { %v990_v13 = vshrl.u32 %v1782_v10, %v2342_v3  ;;  %vm992_vm13 = vcmp.lt.s32.totalorder %v2338_v44, 1  ;;  %v2361_v20 = vshll.u32 %v968_v61, 8  ;;  %vm995_vm14 = vcmp.lt.s32.totalorder %v2338_v44, 4  ;;  %s2476_s2 = sld [smem:[#allocation10 + $0x1a]] }
  0xad   : > { %v2363_v21 = vor.u32 %v978_v6, %v977_v36  ;;  %v2365_v17 = vor.u32 %v981_v9, %v980_v4  ;;  %v2367_v19 = vor.u32 %v984_v11, %v983_v63  ;;  %v617_v8 = vadd.f32 %v616_v31, %v614_v37  ;;  %s2481_s3 = sld [smem:[#allocation9 + $0x1b]] }
  0xae   : > { %v2370_v22 = vpop.eup %1540  ;;  %v988_v10 = vor.u32 %v987_v16, %v986_v42  ;;  %v991_v23 = vor.u32 %v990_v13, %v989_v57  ;;  %vm994_vm15 = vcmp.lt.s32.totalorder %v2338_v44, 3  ;;  %v2376_v25 = vsel %vm1391_vm12, 0, %v1390_v59  ;;  %s2483_s18 = sld [smem:[#allocation12 + $0x18]] }
  0xaf   : > { %vm993_vm0 = vcmp.lt.s32.totalorder %v2338_v44, 2  ;;  %v1000_v26 = vsel %vm992_vm13, %v2363_v21, %v2365_v17  ;;  %v1004_v27 = vsel %vm992_vm13, %v2365_v17, %v2367_v19  ;;  %v625_v28 = vmul.f32 %v624_v5, %v2011_v14 }
  0xb0   : > { %v627_v29 = vstv %s2336_s4  ;;  %v1001_v30 = vsel %vm995_vm14, %v988_v10, 920167782  ;;  %v1005_v33 = vsel %vm995_vm14, %v991_v23, 1326507024  ;;  %v635_v50 = vstv %s2340_s6  ;;  %s2489_s4 = sld [smem:[#allocation10 + $0x1b]] }
  0xb1   : > { %v1002_v34 = vsel %vm994_vm15, %v2367_v19, %v1001_v30  ;;  %v1006_v38 = vsel %vm994_vm15, %v988_v10, %v1005_v33  ;;  %v1009_v39 = vand.u32 65535, %v2361_v20  ;;  %v917_v40 = vsub.s32 4294967266, %v2376_v25  ;;  %s2491_s6 = sld [smem:[#allocation9 + $0x1c]] }
  0xb2   : > { %v1003_v41 = vsel %vm993_vm0, %v1000_v26, %v1002_v34  ;;  %v1007_v24 = vsel %vm993_vm0, %v1004_v27, %v1006_v38  ;;  %v1010_v43 = vshrl.u32 %v2361_v20, 16  ;;  %v588_v48 = vadd.f32 %v587_v1, %v577_v2 }
  0xb3   : > { %v1011_v18 = vand.u32 65535, %v1007_v24  ;;  %v1012_v45 = vshrl.u32 %v1007_v24, 16  ;;  %v1033_v46 = vand.u32 65535, %v1003_v41  ;;  %v1034_v47 = vshrl.u32 %v1003_v41, 16 }
  0xb4   : > { %v598_v49 = vmul.f32 %v1539_v15, %v597_v52  ;;  %1542 = vtanh.f32 %v617_v8  ;;  %v628_v51 = vadd.f32 %v627_v29, %v625_v28  ;;  %v636_v37 = vmul.f32 %v635_v50, %v2011_v14 }
  0xb5   : > { %v1013_v55 = vmul.u32 %v1011_v18, %v1009_v39  ;;  %v1014_v31 = vmul.u32 %v1012_v45, %v1009_v39  ;;  %v1015_v59 = vmul.u32 %v1011_v18, %v1010_v43  ;;  %v638_v60 = vstv %s2372_s23  ;;  %s2501_s23 = sld [smem:[#allocation12 + $0x19]] }
  0xb6   : > { %v913_v61 = vsub.s32 32, %v2376_v25  ;;  %v918_v36 = vadd.s32 127, %v917_v40  ;;  %v2411_v4 = vmul.u32 %v1034_v47, %v1009_v39  ;;  %v1016_v63 = vmul.u32 %v1012_v45, %v1010_v43 }
  0xb7   : > { %v1017_v5 = vshll.u32 %v1014_v31, 16  ;;  %v1019_v42 = vshll.u32 %v1015_v59, 16  ;;  %v1035_v2 = vmul.u32 %v1033_v46, %v1009_v39  ;;  %v599_v52 = vadd.f32 %v598_v49, %v588_v48 }
  0xb8   : > { %1544 = vtanh.f32 %v628_v51  ;;  %v914_v1 = vshll.u32 %v2294_v58, %v2376_v25  ;;  %v2417_v57 = vmul.u32 %v1033_v46, %v1010_v43  ;;  %v1038_v9 = vmul.u32 %v1034_v47, %v1010_v43 }
  0xb9   : > { %vm1021_vm1 = vc.u32 %v1013_v55, %v1017_v5  ;;  %v1023_v6 = vadd.s32 %v1017_v5, %v1013_v55  ;;  %v1039_v11 = vshll.u32 %v2411_v4, 16  ;;  %v915_v16 = vshrl.u32 %v2334_v56, %v913_v61  ;;  %v1387_v61 = vld [vmem:[%s1964_s30 + $0x8] sm:$0xff] }
  0xba   : > { %v1543_v15 = vpop.eup %1542  ;;  %v919_v13 = vshll.u32 %v918_v36, 23  ;;  %v1018_v8 = vshrl.u32 %v1014_v31, 16  ;;  %v1022_v10 = vsel %vm1021_vm1, 1, %v1787_v62  ;;  %v1041_v23 = vshll.u32 %v2417_v57, 16 }
  0xbb   : > { %v1024_v58 = vadd.s32 %v1022_v10, %v1016_v63  ;;  %vm1025_vm2 = vc.u32 %v1023_v6, %v1019_v42  ;;  %vm1043_vm3 = vc.u32 %v1035_v2, %v1039_v11  ;;  %v646_v25 = vstv %s2406_s24  ;;  %s2506_s24 = sld [smem:[#allocation10 + $0x1c]] }
  0xbc   : > { %v976_v26 = vshrl.u32 %v1786_v32, %v2342_v3  ;;  %v1026_v27 = vsel %vm1025_vm2, 1, %v1787_v62  ;;  %v1044_v56 = vsel %vm1043_vm3, 1, %v1787_v62  ;;  %v997_v28 = vsel %vm995_vm14, %v2367_v19, 2102212464 }
  0xbd   : > { %v1028_v29 = vadd.s32 %v1026_v27, %v1024_v58  ;;  %v1045_v30 = vadd.s32 %v1039_v11, %v1035_v2  ;;  %v1046_v33 = vadd.s32 %v1044_v56, %v1038_v9  ;;  %v609_v34 = vmul.f32 %v2370_v22, %v608_v7  ;;  %v2498_v58 = vld [vmem:[%s1964_s30 + $0x10] sm:$0xff] }
  0xbe   : > { %v1545_v50 = vpop.eup %1544  ;;  %v639_v32 = vadd.f32 %v638_v60, %v636_v37  ;;  %v916_v3 = vor.u32 %v915_v16, %v914_v1  ;;  %v1020_v38 = vshrl.u32 %v1015_v59, 16  ;;  %v920_v39 = vor.u32 4788187, %v919_v13 }
  0xbf   : > { %v1029_v40 = vadd.s32 %v1028_v29, %v1018_v8  ;;  %v1040_v41 = vshrl.u32 %v2411_v4, 16  ;;  %vm1047_vm4 = vc.u32 %v1045_v30, %v1041_v23  ;;  %v647_v19 = vmul.f32 %v646_v25, %v2011_v14 }
  0xc0   : > { %v996_v24 = vsel %vm992_vm13, %v976_v26, %v2363_v21  ;;  %v998_v7 = vsel %vm994_vm15, %v2365_v17, %v997_v28  ;;  %v1048_v22 = vsel %vm1047_vm4, 1, %v1787_v62  ;;  %v649_v43 = vstv %s2413_s13  ;;  %s2511_s13 = sld [smem:[#allocation9 + $0x1d]] }
  0xc1   : > { %v657_v18 = vstv %s2419_s8  ;;  %v1042_v45 = vshrl.u32 %v2417_v57, 16  ;;  %v1050_v46 = vadd.s32 %v1048_v22, %v1046_v33  ;;  %v619_v47 = vstv %s2422_s25  ;;  %s2527_s8 = sld [smem:[#allocation12 + $0x1a]] }
  0xc2   : > { %v2463_v21 = vadd.s32 %v1029_v40, %v1020_v38  ;;  %v2465_v48 = vadd.s32 %v1045_v30, %v1041_v23  ;;  %v921_v17 = vand.u32 2147483647, %v920_v39  ;;  %v923_v62 = vcvt.s32.f32 %v916_v3  ;;  %s2542_s25 = sld [smem:[#allocation10 + $0x1d]] }
  0xc3   : > { %v999_v49 = vsel %vm993_vm0, %v996_v24, %v998_v7  ;;  %v1051_v51 = vadd.s32 %v1050_v46, %v1040_v41  ;;  %1546 = vtanh.f32 %v639_v32  ;;  %v650_v37 = vadd.f32 %v649_v43, %v647_v19 }
  0xc4   : > { %v658_v55 = vmul.f32 %v657_v18, %v2011_v14  ;;  %v610_v31 = vadd.f32 %v609_v34, %v599_v52  ;;  %v620_v59 = vmul.f32 %v1543_v15, %v619_v47  ;;  %v660_v60 = vstv %s2434_s19  ;;  %s2556_s19 = sld [smem:[#allocation10 + $0x1e]] }
  0xc5   : > { %v1052_v36 = vadd.s32 %v1051_v51, %v1042_v45  ;;  %v630_v4 = vstv %s2427_s17  ;;  %v668_v63 = vstv %s2442_s11  ;;  %v1053_v44 = vmul.u32 %v2361_v20, %v999_v49  ;;  %s2549_s17 = sld [smem:[#allocation12 + $0x1b]] }
  0xc6   : > { %vm1055_vm5 = vc.u32 %v2463_v21, %v2465_v48  ;;  %v924_v5 = vmul.f32 %v923_v62, %v921_v17  ;;  %1548 = vtanh.f32 %v650_v37  ;;  %v661_v2 = vadd.f32 %v660_v60, %v658_v55  ;;  %s2562_s11 = sld [smem:[#allocation9 + $0x1f]] }
  0xc7   : > { %v1056_v42 = vadd.s32 1, %v1052_v36  ;;  %v782_v52 = vand.u32 2147483647, %v1387_v61  ;;  %v621_v1 = vadd.f32 %v620_v59, %v610_v31  ;;  %v631_v57 = vmul.f32 %v1545_v50, %v630_v4 }
  0xc8   : > { %v669_v6 = vmul.f32 %v668_v63, %v2011_v14  ;;  %v641_v11 = vstv %s2445_s14  ;;  %v671_v15 = vstv %s2457_s20  ;;  %v679_v16 = vstv %s2461_s21  ;;  %s2564_s14 = sld [smem:[#allocation13]] }
  0xc9   : > { %v1057_v9 = vsel %vm1055_vm5, %v1056_v42, %v1052_v36  ;;  %v1547_v20 = vpop.eup %1546  ;;  %v925_v8 = vxor.u32 2147483648, %v924_v5  ;;  %1550 = vtanh.f32 %v661_v2  ;;  %vm2493_vm6 = vcmp.gt.f32.partialorder %v782_v52, 0.001  ;;  %s2571_s20 = sld [smem:[#allocation12 + $0x1c]] }
  0xca   : > { %v1058_v13 = vadd.s32 %v1057_v9, %v1053_v44  ;;  %vm805_vm7 = vcmp.lt.s32.totalorder %v2498_v58, 0  ;;  %v632_v25 = vadd.f32 %v631_v57, %v621_v1  ;;  %v642_v26 = vmul.f32 %v1547_v20, %v641_v11  ;;  %s2577_s21 = sld [smem:[#allocation10 + $0x1f]] }
  0xcb   : > { %v672_v27 = vadd.f32 %v671_v15, %v669_v6  ;;  %v680_v56 = vmul.f32 %v679_v16, %v2011_v14  ;;  %v652_v29 = vstv %s2470_s22  ;;  %v682_v30 = vstv %s2476_s2  ;;  %v2580_v6 = vld [vmem:[%s1974_s12] sm:$0xff]  ;;  %s2587_s22 = sld [smem:[#allocation13 + $0x1]] }
  0xcc   : > { %v1059_v23 = vadd.s32 536870912, %v1058_v13  ;;  %v1549_v28 = vpop.eup %1548  ;;  %v690_v50 = vstv %s2481_s3  ;;  %vm2515_vm8 = vcmp.le.f32.partialorder %v803_v12, 0.7853982  ;;  %v926_v14 = vsel %vm805_vm7, %v925_v8, %v924_v5  ;;  %v2530_v12 = vld [vmem:[%s1964_s30] sm:$0xff]  ;;  %s2545_s30 = sld [smem:[#allocation9 + $0x1e]] }
  0xcd   : > { %v2523_v32 = vsel %vm2493_vm6, %v1387_v61, 1.0  ;;  %v643_v38 = vadd.f32 %v642_v26, %v632_v25  ;;  %v653_v39 = vmul.f32 %v1549_v28, %v652_v29  ;;  %1552 = vtanh.f32 %v672_v27  ;;  %s2590_s12 = sld [smem:[#allocation12 + $0x1d]] }
  0xce   : > { %v2508_v33 = vshrl.u32 %v1059_v23, 30  ;;  %v683_v40 = vadd.f32 %v682_v30, %v680_v56  ;;  %v663_v41 = vstv %s2483_s18  ;;  %v691_v19 = vmul.f32 %v2530_v12, %v690_v50  ;;  %s2598_s2 = sld [smem:[#allocation13 + $0x2]] }
  0xcf   : > { %v1551_v0 = vpop.eup %1550  ;;  %v2536_v24 = vsel %vm2515_vm8, %v2498_v58, %v926_v14  ;;  %v693_v22 = vstv %s2489_s4  ;;  %v701_v43 = vstv %s2491_s6  ;;  %1554 = vrcp.f32 %v2523_v32  ;;  %s2601_s3 = sld [smem:[#allocation12 + $0x1e]] }
  0xd0   : > { %v1061_v3 = vshll.u32 %v2508_v33, 30  ;;  %v654_v45 = vadd.f32 %v653_v39, %v643_v38  ;;  %v664_v46 = vmul.f32 %v1551_v0, %v663_v41  ;;  %1556 = vtanh.f32 %v683_v40  ;;  %s2610_s18 = sld [smem:[#allocation13 + $0x3]] }
  0xd1   : > { %v2553_v47 = vmul.f32 %v2536_v24, %v2536_v24  ;;  %v694_v17 = vadd.f32 %v693_v22, %v691_v19  ;;  %v702_v62 = vmul.f32 %v2530_v12, %v701_v43  ;;  %v674_v37 = vstv %s2501_s23  ;;  %s2622_s4 = sld [smem:[#allocation13 + $0x4]] }
  0xd2   : > { %v2538_v7 = vsub.s32 %v1058_v13, %v1061_v3  ;;  %v704_v55 = vstv %s2506_s24  ;;  %v712_v31 = vstv %s2511_s13  ;;  %v665_v61 = vadd.f32 %v664_v46, %v654_v45  ;;  %s2636_s6 = sld [smem:[#allocation12 + $0x1f]] }
  0xd3   : > { %v1553_v51 = vpop.eup %1552  ;;  %v939_v36 = vmul.f32 -0.00019511016, %v2553_v47  ;;  %1558 = vtanh.f32 %v694_v17  ;;  %v705_v44 = vadd.f32 %v704_v55, %v702_v62  ;;  %v713_v5 = vmul.f32 %v2530_v12, %v712_v31  ;;  %s2645_s23 = sld [smem:[#allocation13 + $0x5]] }
  0xd4   : > { %vm1063_vm9 = vcmp.lt.s32.totalorder %v2538_v7, 0  ;;  %v1064_v18 = vsub.s32 0, %v2538_v7  ;;  %v675_v63 = vmul.f32 %v1553_v51, %v674_v37  ;;  %v685_v2 = vstv %s2527_s8  ;;  %s2663_s24 = sld [smem:[#allocation13 + $0x6]] }
  0xd5   : > { %v2566_v60 = vpop.eup %1554  ;;  %v715_v52 = vstv %s2542_s25  ;;  %v1054_v1 = vadd.s32 %v2465_v48, %v2463_v21  ;;  %v723_v57 = vstv %s2545_s30  ;;  %v932_v20 = vmul.f32 -0.001358992, %v2553_v47  ;;  %s2673_s13 = sld [smem:[#allocation2]]  ;;  %s1397_s25 = sshll.u32 %s1852_s5, 3 }
  0xd6   : > { %v1065_v49 = vsel %vm1063_vm9, %v1064_v18, %v2538_v7  ;;  %v1557_v42 = vpop.eup %1556  ;;  %v2584_v9 = vmul.f32 %v2566_v60, %v2523_v32  ;;  %v940_v15 = vadd.f32 0.008332121, %v939_v36  ;;  %v676_v13 = vadd.f32 %v675_v63, %v665_v61  ;;  %s2680_s8 = sld [smem:[#allocation13 + $0x7]]  ;;  %s389_s5 = scalar_lea.vmem [#allocation15], %s1281_s0 }
  0xd7   : > { %v1066_v59 = vclz %v1065_v49  ;;  %v686_v8 = vmul.f32 %v1557_v42, %v685_v2  ;;  %1560 = vtanh.f32 %v705_v44  ;;  %v716_v23 = vadd.f32 %v715_v52, %v713_v5 }
  0xd8   : > { %v724_v25 = vmul.f32 %v2530_v12, %v723_v57  ;;  %vm747_vm11 = vcmp.eq.s32.totalorder %v2580_v6, 0  ;;  %v696_v28 = vstv %s2549_s17  ;;  %v726_v29 = vstv %s2556_s19  ;;  %s1129_s19 = scalar_lea.hbm %s2750_s7, %s1397_s25 }
  0xd9   : > { %v1394_v4 = vadd.s32 4294967294, %v1066_v59  ;;  %v1559_v56 = vpop.eup %1558  ;;  %v734_v30 = vstv %s2562_s11  ;;  %v749_v50 = vstv %s2564_s14  ;;  %v933_v14 = vadd.f32 0.041655596, %v932_v20  ;;  %s1131_s11 = sshll.u32 %s389_s5, 4  ;;  %s1133_s14 = sshll.u32 %s1129_s19, 4  ;;  %s1132_s11 = int_to_ptr.vmem [resolvable:$true] %s1131_s11  ;;  %s1134_s14 = int_to_ptr.hbm [resolvable:$true] %s1133_s14 }
  0xda   : > { %v941_v3 = vmul.f32 %v940_v15, %v2553_v47  ;;  %v687_v40 = vadd.f32 %v686_v8, %v676_v13  ;;  %1562 = vtanh.f32 %v716_v23  ;;  %vm751_vm12 = vcmp.eq.s32.totalorder %v2580_v6, 1 }
  0xdb   : > { %vm1395_vm10 = vcmp.lt.s32.totalorder %v1394_v4, 0  ;;  %v927_v0 = vsub.s32 4, %v2270_v53  ;;  %v697_v41 = vmul.f32 %v1559_v56, %v696_v28  ;;  %v727_v19 = vadd.f32 %v726_v29, %v724_v25 }
  0xdc   : > { %v1069_v11 = vsel %vm1395_vm10, 0, %v1394_v4  ;;  %v707_v18 = vstv %s2571_s20  ;;  %v735_v45 = vmul.f32 %v2530_v12, %v734_v30  ;;  %v737_v46 = vstv %s2577_s21  ;;  %s1119_s20 = scalar_lea.sflag [#allocation5], %s1960_s16  ;;  %s1704_s21 = sshra.s32 %s1134_s14, 4  ;;  %s1705_s21 = int_to_ptr.hbm [resolvable:$true] %s1704_s21 }
  0xdd   : > { %v1070_v21 = vsub.s32 32, %v1069_v11  ;;  %v1071_v48 = vshll.u32 %v2538_v7, %v1069_v11  ;;  %v1074_v16 = vsub.s32 4294967266, %v1069_v11  ;;  %v1561_v43 = vpop.eup %1560  ;;  %v750_v17 = vsel %vm747_vm11, %v749_v50, 0.0  ;;  %p1711_p2 = scmp.lt.s32.totalorder %s1705_s21, %s2750_s7 }
  0xde   : > { %v753_v62 = vstv %s2587_s22  ;;  %v934_v49 = vmul.f32 %v933_v14, %v2553_v47  ;;  %v942_v51 = vadd.f32 -0.16666654, %v941_v3  ;;  %v718_v55 = vstv %s2590_s12  ;;  %s1706_s22 = scalar_lea.hbm %s1705_s21, 8 }
  0xdf   : > { %v1072_v26 = vshrl.u32 %v1054_v1, %v1070_v21  ;;  %v1075_v27 = vadd.s32 127, %v1074_v16  ;;  %vm755_vm13 = vcmp.eq.s32.totalorder %v2580_v6, 2  ;;  %v787_v31 = vsub.f32 1.0, %v2584_v9  ;;  %p1707_p1 = scmp.ne.s32.totalorder %s1705_s21, %s1706_s22 }
  0xe0   : > { %v928_v59 = vsel %vm805_vm7, %v927_v0, %v2270_v53  ;;  %v698_v61 = vadd.f32 %v697_v41, %v687_v40  ;;  %v708_v36 = vmul.f32 %v1561_v43, %v707_v18  ;;  %1564 = vtanh.f32 %v727_v19  ;;  %v1563_v63 = vpop.eup %1562 }
  0xe1   : > { %v1073_v38 = vor.u32 %v1072_v26, %v1071_v48  ;;  %v1076_v39 = vshll.u32 %v1075_v27, 23  ;;  %v738_v44 = vadd.f32 %v737_v46, %v735_v45  ;;  %v754_v5 = vsel %vm751_vm12, %v753_v62, %v750_v17  ;;  %p1708_p4 = pnand %p1707_p1, %p1906_p5 }
  0xe2   : > { %vm2626_vm14 = vcmp.le.f32.partialorder %v960_v35, 0.7853982  ;;  %vm962_vm15 = vcmp.lt.s32.totalorder %v2273_v54, 0  ;;  %v757_v53 = vstv %s2598_s2  ;;  %v935_v2 = vadd.f32 -0.4999988, %v934_v49 }
  0xe3   : > { %v1077_v7 = vor.u32 4788187, %v1076_v39  ;;  %v1080_v22 = vcvt.s32.f32 %v1073_v38  ;;  %v943_v52 = vmul.f32 %v942_v51, %v2553_v47  ;;  %v729_v57 = vstv %s2601_s3  ;;  %p1709_p8 = pneg %p1708_p4  ;;  %s1710_s3 = scalar_lea.hbm %s2750_s7, 16 }
  0xe4   : > { %vm759_vm0 = vcmp.eq.s32.totalorder %v2580_v6, 3  ;;  %v788_v9 = vmul.f32 %v2566_v60, %v787_v31  ;;  %v709_v20 = vadd.f32 %v708_v36, %v698_v61  ;;  %v719_v11 = vmul.f32 %v1563_v63, %v718_v55  ;;  %p1712_p11 = scmp.lt.s32.totalorder %s1710_s3, %s1706_s22 }
  0xe5   : > { %v1078_v37 = vand.u32 2147483647, %v1077_v7  ;;  %v930_v35 = vsel %vm2515_vm8, 0, %v928_v59  ;;  %v758_v21 = vsel %vm755_vm13, %v757_v53, %v754_v5  ;;  %v761_v48 = vstv %s2610_s18 }
  0xe6   : > { %v1084_v16 = vsub.s32 4, %v2508_v33  ;;  %v1565_v8 = vpop.eup %1564  ;;  %1566 = vtanh.f32 %v738_v44  ;;  %v936_v34 = vmul.f32 %v935_v2, %v2553_v47  ;;  %v944_v23 = vadd.f32 1.0, %v943_v52  ;;  %p1713_p9 = por %p1712_p11, %p1711_p2 }
  0xe7   : > { %v1081_v4 = vmul.f32 %v1080_v22, %v1078_v37  ;;  %vm763_vm1 = vcmp.eq.s32.totalorder %v2580_v6, 4  ;;  %vm790_vm2 = vweird.f32 %v2523_v32  ;;  %vm791_vm3 = vweird.f32 %v2566_v60 }
  0xe8   : > { %v947_v26 = vadd.s32 3, %v930_v35  ;;  %v762_v27 = vsel %vm759_vm0, %v761_v48, %v758_v21  ;;  %v796_v56 = vand.u32 2147483648, %v2523_v32  ;;  %v720_v47 = vadd.f32 %v719_v11, %v709_v20  ;;  %vm2686_vm5 = vmor %vm790_vm2, %vm791_vm3  ;;  %p1714_p10 = pnand %p1713_p9, %p1709_p8 }
  0xe9   : > { %v1082_v1 = vxor.u32 2147483648, %v1081_v4  ;;  %v730_v30 = vmul.f32 %v1565_v8, %v729_v57  ;;  %v765_v50 = vstv %s2622_s4  ;;  %v1085_v14 = vsel %vm962_vm15, %v1084_v16, %v2508_v33 }
  0xea   : > { %v937_v3 = vadd.f32 1.0, %v936_v34  ;;  %v945_v38 = vmul.f32 %v944_v23, %v2536_v24  ;;  %vm767_vm4 = vcmp.eq.s32.totalorder %v2580_v6, 5  ;;  %v789_v0 = vadd.f32 %v2566_v60, %v788_v9 }
  0xeb   : > { %v1083_v15 = vsel %vm962_vm15, %v1082_v1, %v1081_v4  ;;  %v794_v41 = vand.u32 2147483647, %v2523_v32  ;;  %v948_v19 = vand.u32 3, %v947_v26  ;;  %v740_v22 = vstv %s2636_s6 }
  0xec   : > { %v2651_v13 = vsel %vm2626_vm14, %v2273_v54, %v1083_v15  ;;  %v1567_v7 = vpop.eup %1566  ;;  %v1087_v33 = vsel %vm2626_vm14, 0, %v1085_v14  ;;  %v731_v45 = vadd.f32 %v730_v30, %v720_v47  ;;  %v766_v24 = vsel %vm763_vm1, %v765_v50, %v762_v27 }
  0xed   : > { %v1088_v25 = vmul.f32 %v2651_v13, %v2651_v13  ;;  %v769_v46 = vstv %s2645_s23  ;;  %v797_v62 = vor.u32 1.1754944e-38, %v796_v56  ;;  %v951_v49 = vxor.u32 2147483648, %v945_v38 }
  0xee   : > { %v954_v51 = vxor.u32 2147483648, %v937_v3  ;;  %v741_v31 = vmul.f32 %v1567_v7, %v740_v22  ;;  %vm950_vm7 = vcmp.eq.s32.totalorder %v948_v19, 0  ;;  %vm953_vm8 = vcmp.eq.s32.totalorder %v948_v19, 2 }
  0xef   : > { %v1089_v28 = vmul.f32 -0.001358992, %v1088_v25  ;;  %v1096_v29 = vmul.f32 -0.00019511016, %v1088_v25  ;;  %v1104_v59 = vand.u32 3, %v1087_v33  ;;  %v793_v61 = vsel %vm2686_vm5, %v2566_v60, %v789_v0 }
  0xf0   : > { %vm795_vm9 = vcmp.eq.f32.partialorder %v794_v41, 8.507059e+37  ;;  %v770_v4 = vsel %vm767_vm4, %v769_v46, %v766_v24  ;;  %vm771_vm10 = vcmp.eq.s32.totalorder %v2580_v6, 6  ;;  %v773_v63 = vstv %s2663_s24 }
  0xf1   : > { %v1090_v39 = vadd.f32 0.041655596, %v1089_v28  ;;  %v1097_v40 = vadd.f32 0.008332121, %v1096_v29  ;;  %vm949_vm11 = vcmp.lt.s32.totalorder %v948_v19, 2  ;;  %v952_v44 = vsel %vm950_vm7, %v937_v3, %v951_v49 }
  0xf2   : > { %v955_v5 = vsel %vm953_vm8, %v954_v51, %v945_v38  ;;  %v742_v2 = vadd.f32 %v741_v31, %v731_v45  ;;  %vm775_vm12 = vcmp.eq.s32.totalorder %v2580_v6, 7  ;;  %v798_v60 = vsel %vm795_vm9, %v797_v62, %v793_v61 }
  0xf3   : > { %v1091_v43 = vmul.f32 %v1090_v39, %v1088_v25  ;;  %v1098_v18 = vmul.f32 %v1097_v40, %v1088_v25  ;;  %vm1109_vm13 = vcmp.eq.s32.totalorder %v1104_v59, 2  ;;  %v744_v52 = vstv %s2673_s13 }
  0xf4   : > { %v774_v1 = vsel %vm771_vm10, %v773_v63, %v770_v4  ;;  %v777_v20 = vstv %s2680_s8  ;;  %vm946_vm14 = vweird.f32 %v2498_v58  ;;  %v956_v11 = vsel %vm949_vm11, %v952_v44, %v955_v5 }
  0xf5   : > { %v1092_v37 = vadd.f32 -0.4999988, %v1091_v43  ;;  %v1099_v55 = vadd.f32 -0.16666654, %v1098_v18  ;;  %vm1106_vm15 = vcmp.eq.s32.totalorder %v1104_v59, 0  ;;  %v799_v35 = vmul.f32 %v2530_v12, %v798_v60 }
  0xf6   : > { %vm1105_vm0 = vcmp.lt.s32.totalorder %v1104_v59, 2  ;;  %v745_v48 = vadd.f32 %v744_v52, %v742_v2  ;;  %vm1103_vm1 = vweird.f32 %v2273_v54  ;;  %v778_v16 = vsel %vm775_vm12, %v777_v20, %v774_v1 }
  0xf7   : > { %v1093_v32 = vmul.f32 %v1092_v37, %v1088_v25  ;;  %v1100_v36 = vmul.f32 %v1099_v55, %v1088_v25  ;;  %v800_v58 = vsel %vm2493_vm6, %v799_v35, 0.0 }
  0xf8   : > { %v779_v23 = vsub.f32 %v745_v48, %v778_v16 }
  0xf9   : > { %v1094_v42 = vadd.f32 1.0, %v1093_v32  ;;  %v1101_v53 = vadd.f32 1.0, %v1100_v36 }
  0xfb   : > { %v1102_v57 = vmul.f32 %v1101_v53, %v2651_v13  ;;  %v1110_v9 = vxor.u32 2147483648, %v1094_v42  ;;  %v957_v13 = vsel %vm946_vm14, nan, %v956_v11 }
  0xfd   : > { %v1107_v15 = vxor.u32 2147483648, %v1102_v57  ;;  %v1111_v21 = vsel %vm1109_vm13, %v1110_v9, %v1102_v57 }
  0xff   : > { %v1108_v8 = vsel %vm1106_vm15, %v1094_v42, %v1107_v15 }
 0x100   : > { %v1112_v34 = vsel %vm1105_vm0, %v1108_v8, %v1111_v21 }
 0x101   : > { %v1113_v12 = vsel %vm1103_vm1, nan, %v1112_v34 }
 0x102   : > { %v1114_v25 = vmul.f32 %v1113_v12, %v957_v13 }
 0x104   : > { %v1115_v54 = vadd.f32 %v1114_v25, %v800_v58 }
 0x106   : > { %v1116_v6 = vmul.f32 %v1115_v54, %v779_v23 }
 0x108   : > { %1117 = vst [vmem:[%s389_s5] sm:$0xff] %v1116_v6 }
 0x109   : > { %1717 = shalt.err (!%p1714_p10)
}
 0x10a   : > { %1420 = dma.vmem_to_hbm [thread:$0]  (%p1906_p5), %s1132_s11, 128, %s1134_s14, %s1119_s20  }
 0x10b PF: > { %s1145_s16 = sand.u32 1, %s1760_s26   ;;  %p2779_p12 = scmp.ge.s32.totalorder %s1772_s29, 2 }
 0x10c   : > { %s1146_s4 = scalar_lea.sflag [#allocation5], %s1145_s16 }
 0x10d   : > { %p1443_p13 = pnand %p2779_p12, %p1866_p6 }
 0x10f   : > { %p1444_p0 = pneg %p1443_p13 }
 0x111   : > { %1755 = dma.done.wait (%p1444_p0), %s1146_s4, 128  }
 0x112   : > { %1757 = vsyncadd (%p1444_p0), %s1146_s4, 4294967168  ;;  %s2780_s6 = sld [smem:[#allocation22_spill]]  ;;  %p27_p3 = scmp.ge.s32.totalorder %s1893_s10, 4  }
 0x113   : > { %s2781_s26 = smov %s1764_s27  ;;  %s2782_s27 = smov %s1768_s28 }
 0x114   : > { %s2784_s29 = smov %s1893_s10  ;;  %29 = sbr.rel (!%p27_p3) target bundleno = 17 (0x11), region = 126 }
 0x118   : > { %s2783_s28 = smov %s2780_s6 }
 0x119   :  { %1152 = vsyncpa [#allocation4], 1 }
 0x11a   :  { %1154 = vsyncpa [#allocation4 + $0x1], 1 }
 0x11b   :  { %1155 = vsyncpa [#allocation8], 1 }
 0x11c   :  { %1157 = vsyncpa [#allocation8 + $0x1], 1 }
 0x11d   :  { %1158 = vsyncpa [#allocation5], 1 }
 0x11e   :  { %1160 = vsyncpa [#allocation5 + $0x1], 1 }
 0x11f   :  { %1161 = vsyncpa [#allocation6], 1 }
 0x120   :  { %1163 = vsyncpa [#allocation6 + $0x1], 1 }
 0x121   :  { %1164 = vsyncpa [#allocation11], 1 }
 0x122   :  { %1165 = vsyncpa [#allocation14], 1 }

</bundles_post_ra>
